<compile_context>
chip_gen: v7x
topology: tpu7x:2x2x1
jax: 0.10.0
libtpu: 0.0.40
codegen_flags: <defaults>
</compile_context>

<pallas_src>
import itertools

import jax
import jax.numpy as jnp
import numpy as np
from jax import lax
from jax.experimental import pallas as pl
from jax.experimental.pallas import tpu as pltpu

# matcher weights (module defaults)
UPPER_W, LOWER_W, CURVE_W, LABEL_W = 2.0, 2.0, 5.0, 3.0


def _round_up(x, m):
    return ((x + m - 1) // m) * m


def _matcher_cost_kernel(logits_ref, lane_ref, upp_ref, low_ref,
                         kx_ref, ky_ref, w_ref, c_ref):
    f32 = jnp.float32

    # ---- cost_label: -softmax(logits)[..., 1] broadcast over targets --------
    logits = logits_ref[...].astype(f32)                        # (TQ, NC)
    nc = logits.shape[-1]
    if nc == 2:
        # softmax(l)[1] == sigmoid(l1 - l0): one exp (EUP), no lane reductions.
        prob1 = 1.0 / (1.0 + jnp.exp(logits[:, 0:1] - logits[:, 1:2]))
    else:
        m = jnp.max(logits, axis=-1, keepdims=True)
        e = jnp.exp(logits - m)
        prob1 = e[:, 1:2] / jnp.sum(e, axis=-1, keepdims=True)
    cost_label = -prob1                                         # (TQ, 1) -> bcast (TQ, Gp)

    # ---- cost_upper / cost_lower: p=1 cdist of scalars -----------------------
    lane = lane_ref[...].astype(f32)                            # (TQ, 8)
    upp = upp_ref[...]                                          # (1, Gp)
    low = low_ref[...]                                          # (1, Gp)
    cost_upper = jnp.abs(lane[:, 0:1] - upp)                    # (TQ, Gp)
    cost_lower = jnp.abs(lane[:, 1:2] - low)                    # (TQ, Gp)

    # ---- cost_curve: cubic curve evaluated at target y, L1 vs target x ------
    # TODO(synk): cubic_curve_with_projection source was not provided; using the
    # standard LSTR parameterization x = k''/(y-f)^2 + m''/(y-f) + n + b''*y - b'''
    c0 = lane[:, 2:3]
    c1 = lane[:, 3:4]
    c2 = lane[:, 4:5]
    c3 = lane[:, 5:6]
    c4 = lane[:, 6:7]
    c5 = lane[:, 7:8]

    tq = lane.shape[0]
    gp = upp.shape[1]
    n_pts = kx_ref.shape[0]

    def body(p, acc):
        y = ky_ref[pl.ds(p, 1), :]                              # (1, Gp)
        kx = kx_ref[pl.ds(p, 1), :]                             # (1, Gp)
        w = w_ref[pl.ds(p, 1), :]                               # (1, Gp) = valid * norm_w
        dy = y - c1                                             # (TQ, Gp)
        inv = 1.0 / dy                                          # single divide per point
        x = (c0 * inv + c2) * inv + c3 + c4 * y - c5            # (TQ, Gp)
        return acc + jnp.abs(x - kx) * w

    cost_curve = lax.fori_loop(0, n_pts, body,
                               jnp.zeros((tq, gp), f32), unroll=True)

    c_ref[...] = (LABEL_W * cost_label + CURVE_W * cost_curve
                  + LOWER_W * cost_lower + UPPER_W * cost_upper)


def hungarian_cost_matrix(logits, curves, target_uppers, target_lowers,
                          target_keypoints, *, tq=None):
    """Compute the (bs*num_queries, num_gt) matching cost matrix on TPU."""
    bs, nq, nc = logits.shape
    bq = bs * nq
    ncv = curves.shape[-1]
    g = target_uppers.shape[0]
    p = target_keypoints.shape[1]

    # Query tile: large tiles amortize per-grid-step overhead; whole BQ when small.
    # (On v7x keep >= 2 grid steps for the two TensorCores when BQ is large.)
    if tq is None:
        tq = min(256, _round_up(bq, 8))
    tq = max(8, _round_up(tq, 8))
    bq_pad = _round_up(bq, tq)
    g_pad = _round_up(g, 128)                # lane-dense target axis

    logits2 = logits.reshape(bq, nc).astype(jnp.float32)
    lane = curves.reshape(bq, ncv).astype(jnp.float32)
    if bq_pad != bq:
        logits2 = jnp.pad(logits2, ((0, bq_pad - bq), (0, 0)))
        lane = jnp.pad(lane, ((0, bq_pad - bq), (0, 0)))

    # ---- lane_normalize_in_batch hoisted out of the kernel (target-only) ----
    kpts = target_keypoints.astype(jnp.float32)                 # (G, P, 2)
    kx = kpts[:, :, 0]                                          # (G, P)
    ky = kpts[:, :, 1]                                          # (G, P)
    valid = (kx > 0).astype(jnp.float32)                        # (G, P)
    # NOTE: matches the PyTorch module exactly; a lane with zero valid points
    # would produce inf in norm_weights there too.
    nw = jnp.sqrt(valid.sum() / valid.sum(axis=-1))             # (G,)
    nw = nw / nw.max()
    w = valid * nw[:, None]                                     # (G, P)

    # Lane-dense target layouts: (P, G_pad); padded columns get zero weight.
    def pad_cols(a):                                            # a: (*, G)
        return jnp.pad(a, ((0, 0), (0, g_pad - g)))

    kx_t = pad_cols(kx.T)                                       # (P, G_pad)
    ky_t = pad_cols(ky.T)                                       # (P, G_pad)
    w_t = pad_cols(w.T)                                         # (P, G_pad)
    upp = pad_cols(target_uppers.reshape(1, g).astype(jnp.float32))
    low = pad_cols(target_lowers.reshape(1, g).astype(jnp.float32))

    # Explicit scoped-VMEM budget (double-buffered IO + temps), with headroom,
    # capped below v7x's 64 MiB physical VMEM.
    est_bytes = 4 * (2 * (tq * nc + tq * ncv + 2 * g_pad + 3 * p * g_pad + tq * g_pad)
                     + 2 * tq * g_pad)
    vmem_limit = int(min(max(4 * est_bytes, 32 << 20), 60 << 20))

    c_pad = pl.pallas_call(
        _matcher_cost_kernel,
        out_shape=jax.ShapeDtypeStruct((bq_pad, g_pad), jnp.float32),
        grid_spec=pltpu.PrefetchScalarGridSpec(
            num_scalar_prefetch=0,
            grid=(bq_pad // tq,),
            in_specs=[
                pl.BlockSpec((tq, nc), lambda i: (i, 0)),
                pl.BlockSpec((tq, ncv), lambda i: (i, 0)),
                pl.BlockSpec((1, g_pad), lambda i: (0, 0)),
                pl.BlockSpec((1, g_pad), lambda i: (0, 0)),
                pl.BlockSpec((p, g_pad), lambda i: (0, 0)),
                pl.BlockSpec((p, g_pad), lambda i: (0, 0)),
                pl.BlockSpec((p, g_pad), lambda i: (0, 0)),
            ],
            out_specs=pl.BlockSpec((tq, g_pad), lambda i: (i, 0)),
        ),
        compiler_params=pltpu.CompilerParams(
            dimension_semantics=("parallel",),
            vmem_limit_bytes=vmem_limit,
        ),
    )(logits2, lane, upp, low, kx_t, ky_t, w_t)

    # Drop padded query rows and padded target columns before host-side LSA.
    return c_pad[:bq, :g]


def reference_cost(logits, curves, uppers, lowers, kpts):
    """Pure-JAX reference replicating the PyTorch forward (pre-assignment)."""
    bs, nq, nc = logits.shape
    bq = bs * nq
    out_prob = jax.nn.softmax(logits.reshape(bq, nc), axis=-1)
    lane = curves.reshape(bq, -1)
    cost_label = -out_prob[:, 1:2]
    cost_upper = jnp.abs(lane[:, 0:1] - uppers[None, :])
    cost_lower = jnp.abs(lane[:, 1:2] - lowers[None, :])
    kx, ky = kpts[:, :, 0], kpts[:, :, 1]
    valid = (kx > 0).astype(jnp.float32)
    nw = jnp.sqrt(valid.sum() / valid.sum(-1))
    nw = nw / nw.max()
    coef = lane[:, 2:]
    y = ky[None]
    c = [coef[:, i][:, None, None] for i in range(6)]
    dy = y - c[1]
    x = c[0] / (dy * dy) + c[2] / dy + c[3] + c[4] * y - c[5]
    cost_curve = (jnp.abs(x - kx[None]) * valid[None]).sum(-1) * nw[None]
    return (LABEL_W * cost_label + CURVE_W * cost_curve
            + LOWER_W * cost_lower + UPPER_W * cost_upper)


def _brute_force_lsa(cost):
    """Tiny-scale replacement for scipy.optimize.linear_sum_assignment (host glue)."""
    nq, g = cost.shape
    best, best_val = None, np.inf
    for perm in itertools.permutations(range(nq), g):
        v = sum(cost[perm[j], j] for j in range(g))
        if v < best_val:
            best_val, best = v, perm
    rows = np.asarray(best)
    cols = np.arange(g)
    order = np.argsort(rows)
    return rows[order], cols[order]


if __name__ == "__main__":
    key = jax.random.PRNGKey(0)
    bs, nq, nc, ncurve = 2, 8, 2, 8          # batch, queries, classes, curve params
    sizes = [3, 3]                           # ground-truth lanes per sample
    g = sum(sizes)
    p = 20                                   # keypoints per lane

    k1, k2, k3, k4, k5, k6 = jax.random.split(key, 6)
    logits = jax.random.normal(k1, (bs, nq, nc), jnp.float32)
    curves = jax.random.normal(k2, (bs, nq, ncurve), jnp.float32) * 0.1
    # predicted upper/lower vertical extents in [0, 1]
    curves = curves.at[:, :, 0:2].set(jax.random.uniform(k3, (bs, nq, 2)))
    # keep the pole (y - f) of the curve away from the keypoint y-range
    curves = curves.at[:, :, 3].set(-jnp.abs(curves[:, :, 3]) - 0.5)

    uppers = jax.random.uniform(k4, (g,), minval=0.5, maxval=1.0)
    lowers = jax.random.uniform(k5, (g,), minval=0.0, maxval=0.5)
    kpts = jax.random.uniform(k6, (g, p, 2), minval=0.1, maxval=1.0)
    # invalidate (x <= 0) the last `gi` points of lane gi -> non-trivial norm weights
    keep = (jnp.arange(p)[None, :] < (p - jnp.arange(g)[:, None])).astype(jnp.float32)
    kpts = kpts.at[:, :, 0].multiply(keep)

    C = hungarian_cost_matrix(logits, curves, uppers, lowers, kpts)
    C = jax.block_until_ready(C)

    C_ref = reference_cost(logits, curves, uppers, lowers, kpts)
    assert C.shape == (bs * nq, g)
    assert jnp.allclose(C, C_ref, rtol=1e-4, atol=1e-4), "kernel mismatch vs reference"

    # host-side per-sample assignment (Hungarian / linear_sum_assignment is glue,
    # not a TPU kernel op)
    Cn = np.asarray(C).reshape(bs, nq, g)
    indices, col0 = [], 0
    for b, gi in enumerate(sizes):
        rows, cols = _brute_force_lsa(Cn[b, :, col0:col0 + gi])
        indices.append((rows.astype(np.int64), cols.astype(np.int64)))
        col0 += gi

    print("KERNEL_OK")
</pallas_src>

<mosaic_0001>
module attributes {stable_mosaic.version = 11 : i64} {
  func.func @_matcher_cost_kernel(%arg0: i32, %arg1: memref<16x2xf32, #tpu.memory_space<vmem>>, %arg2: memref<16x8xf32, #tpu.memory_space<vmem>>, %arg3: memref<1x128xf32, #tpu.memory_space<vmem>>, %arg4: memref<1x128xf32, #tpu.memory_space<vmem>>, %arg5: memref<20x128xf32, #tpu.memory_space<vmem>>, %arg6: memref<20x128xf32, #tpu.memory_space<vmem>>, %arg7: memref<20x128xf32, #tpu.memory_space<vmem>>, %arg8: memref<16x128xf32, #tpu.memory_space<vmem>>) attributes {dimension_semantics = [#tpu.dimension_semantics<parallel>], iteration_bounds = array<i64: 1>, scalar_prefetch = 0 : i64, scratch_operands = 0 : i64, tpu.core_type = #tpu.core_type<tc>, window_params = [{transform_indices = @transform_0, window_bounds = array<i64: 16, 2>}, {transform_indices = @transform_1, window_bounds = array<i64: 16, 8>}, {pipeline_mode = #tpu.pipeline_mode<synchronous>, transform_indices = @transform_2, window_bounds = array<i64: 1, 128>}, {pipeline_mode = #tpu.pipeline_mode<synchronous>, transform_indices = @transform_3, window_bounds = array<i64: 1, 128>}, {pipeline_mode = #tpu.pipeline_mode<synchronous>, transform_indices = @transform_4, window_bounds = array<i64: 20, 128>}, {pipeline_mode = #tpu.pipeline_mode<synchronous>, transform_indices = @transform_5, window_bounds = array<i64: 20, 128>}, {pipeline_mode = #tpu.pipeline_mode<synchronous>, transform_indices = @transform_6, window_bounds = array<i64: 20, 128>}, {transform_indices = @transform_7, window_bounds = array<i64: 16, 128>}]} {
    %c0 = arith.constant 0 : index
    %c0_0 = arith.constant 0 : index
    %0 = vector.load %arg1[%c0, %c0_0] : memref<16x2xf32, #tpu.memory_space<vmem>>, vector<16x2xf32>
    %1 = vector.extract_strided_slice %0 {offsets = [0, 0], sizes = [16, 1], strides = [1, 1]} : vector<16x2xf32> to vector<16x1xf32>
    %2 = vector.extract_strided_slice %0 {offsets = [0, 1], sizes = [16, 1], strides = [1, 1]} : vector<16x2xf32> to vector<16x1xf32>
    %3 = arith.subf %1, %2 : vector<16x1xf32>
    %4 = math.exp %3 : vector<16x1xf32>
    %cst = arith.constant 1.000000e+00 : f32
    %5 = vector.broadcast %cst : f32 to vector<16x1xf32>
    %6 = arith.addf %5, %4 : vector<16x1xf32>
    %cst_1 = arith.constant 1.000000e+00 : f32
    %7 = vector.broadcast %cst_1 : f32 to vector<16x1xf32>
    %8 = arith.divf %7, %6 : vector<16x1xf32>
    %cst_2 = arith.constant 0.000000e+00 : f32
    %9 = vector.broadcast %cst_2 : f32 to vector<16x1xf32>
    %10 = arith.subf %9, %8 : vector<16x1xf32>
    %c0_3 = arith.constant 0 : index
    %c0_4 = arith.constant 0 : index
    %11 = vector.load %arg2[%c0_3, %c0_4] : memref<16x8xf32, #tpu.memory_space<vmem>>, vector<16x8xf32>
    %c0_5 = arith.constant 0 : index
    %c0_6 = arith.constant 0 : index
    %12 = vector.load %arg3[%c0_5, %c0_6] : memref<1x128xf32, #tpu.memory_space<vmem>>, vector<1x128xf32>
    %c0_7 = arith.constant 0 : index
    %c0_8 = arith.constant 0 : index
    %13 = vector.load %arg4[%c0_7, %c0_8] : memref<1x128xf32, #tpu.memory_space<vmem>>, vector<1x128xf32>
    %14 = vector.extract_strided_slice %11 {offsets = [0, 0], sizes = [16, 1], strides = [1, 1]} : vector<16x8xf32> to vector<16x1xf32>
    %15 = vector.broadcast %14 : vector<16x1xf32> to vector<16x128xf32>
    %16 = vector.broadcast %12 : vector<1x128xf32> to vector<16x128xf32>
    %17 = arith.subf %15, %16 : vector<16x128xf32>
    %18 = math.absf %17 : vector<16x128xf32>
    %19 = vector.extract_strided_slice %11 {offsets = [0, 1], sizes = [16, 1], strides = [1, 1]} : vector<16x8xf32> to vector<16x1xf32>
    %20 = vector.broadcast %19 : vector<16x1xf32> to vector<16x128xf32>
    %21 = vector.broadcast %13 : vector<1x128xf32> to vector<16x128xf32>
    %22 = arith.subf %20, %21 : vector<16x128xf32>
    %23 = math.absf %22 : vector<16x128xf32>
    %24 = vector.extract_strided_slice %11 {offsets = [0, 2], sizes = [16, 1], strides = [1, 1]} : vector<16x8xf32> to vector<16x1xf32>
    %25 = vector.extract_strided_slice %11 {offsets = [0, 3], sizes = [16, 1], strides = [1, 1]} : vector<16x8xf32> to vector<16x1xf32>
    %26 = vector.extract_strided_slice %11 {offsets = [0, 4], sizes = [16, 1], strides = [1, 1]} : vector<16x8xf32> to vector<16x1xf32>
    %27 = vector.extract_strided_slice %11 {offsets = [0, 5], sizes = [16, 1], strides = [1, 1]} : vector<16x8xf32> to vector<16x1xf32>
    %28 = vector.extract_strided_slice %11 {offsets = [0, 6], sizes = [16, 1], strides = [1, 1]} : vector<16x8xf32> to vector<16x1xf32>
    %29 = vector.extract_strided_slice %11 {offsets = [0, 7], sizes = [16, 1], strides = [1, 1]} : vector<16x8xf32> to vector<16x1xf32>
    %cst_9 = arith.constant 0.000000e+00 : f32
    %30 = vector.broadcast %cst_9 : f32 to vector<16x128xf32>
    %c0_i32 = arith.constant 0 : i32
    %31 = arith.index_cast %c0_i32 : i32 to index
    %c0_10 = arith.constant 0 : index
    %32 = vector.load %arg6[%31, %c0_10] : memref<20x128xf32, #tpu.memory_space<vmem>>, vector<1x128xf32>
    %33 = arith.index_cast %c0_i32 : i32 to index
    %c0_11 = arith.constant 0 : index
    %34 = vector.load %arg5[%33, %c0_11] : memref<20x128xf32, #tpu.memory_space<vmem>>, vector<1x128xf32>
    %35 = arith.index_cast %c0_i32 : i32 to index
    %c0_12 = arith.constant 0 : index
    %36 = vector.load %arg7[%35, %c0_12] : memref<20x128xf32, #tpu.memory_space<vmem>>, vector<1x128xf32>
    %37 = vector.broadcast %32 : vector<1x128xf32> to vector<16x128xf32>
    %38 = vector.broadcast %25 : vector<16x1xf32> to vector<16x128xf32>
    %39 = arith.subf %37, %38 : vector<16x128xf32>
    %cst_13 = arith.constant 1.000000e+00 : f32
    %40 = vector.broadcast %cst_13 : f32 to vector<16x128xf32>
    %41 = arith.divf %40, %39 : vector<16x128xf32>
    %42 = vector.broadcast %24 : vector<16x1xf32> to vector<16x128xf32>
    %43 = arith.mulf %42, %41 : vector<16x128xf32>
    %44 = vector.broadcast %26 : vector<16x1xf32> to vector<16x128xf32>
    %45 = arith.addf %43, %44 : vector<16x128xf32>
    %46 = arith.mulf %45, %41 : vector<16x128xf32>
    %47 = vector.broadcast %27 : vector<16x1xf32> to vector<16x128xf32>
    %48 = arith.addf %46, %47 : vector<16x128xf32>
    %49 = vector.broadcast %28 : vector<16x1xf32> to vector<16x128xf32>
    %50 = vector.broadcast %32 : vector<1x128xf32> to vector<16x128xf32>
    %51 = arith.mulf %49, %50 : vector<16x128xf32>
    %52 = arith.addf %48, %51 : vector<16x128xf32>
    %53 = vector.broadcast %29 : vector<16x1xf32> to vector<16x128xf32>
    %54 = arith.subf %52, %53 : vector<16x128xf32>
    %55 = vector.broadcast %34 : vector<1x128xf32> to vector<16x128xf32>
    %56 = arith.subf %54, %55 : vector<16x128xf32>
    %57 = math.absf %56 : vector<16x128xf32>
    %58 = vector.broadcast %36 : vector<1x128xf32> to vector<16x128xf32>
    %59 = arith.mulf %57, %58 : vector<16x128xf32>
    %60 = arith.addf %30, %59 : vector<16x128xf32>
    %c1_i32 = arith.constant 1 : i32
    %61 = arith.index_cast %c1_i32 : i32 to index
    %c0_14 = arith.constant 0 : index
    %62 = vector.load %arg6[%61, %c0_14] : memref<20x128xf32, #tpu.memory_space<vmem>>, vector<1x128xf32>
    %63 = arith.index_cast %c1_i32 : i32 to index
    %c0_15 = arith.constant 0 : index
    %64 = vector.load %arg5[%63, %c0_15] : memref<20x128xf32, #tpu.memory_space<vmem>>, vector<1x128xf32>
    %65 = arith.index_cast %c1_i32 : i32 to index
    %c0_16 = arith.constant 0 : index
    %66 = vector.load %arg7[%65, %c0_16] : memref<20x128xf32, #tpu.memory_space<vmem>>, vector<1x128xf32>
    %67 = vector.broadcast %62 : vector<1x128xf32> to vector<16x128xf32>
    %68 = vector.broadcast %25 : vector<16x1xf32> to vector<16x128xf32>
    %69 = arith.subf %67, %68 : vector<16x128xf32>
    %cst_17 = arith.constant 1.000000e+00 : f32
    %70 = vector.broadcast %cst_17 : f32 to vector<16x128xf32>
    %71 = arith.divf %70, %69 : vector<16x128xf32>
    %72 = vector.broadcast %24 : vector<16x1xf32> to vector<16x128xf32>
    %73 = arith.mulf %72, %71 : vector<16x128xf32>
    %74 = vector.broadcast %26 : vector<16x1xf32> to vector<16x128xf32>
    %75 = arith.addf %73, %74 : vector<16x128xf32>
    %76 = arith.mulf %75, %71 : vector<16x128xf32>
    %77 = vector.broadcast %27 : vector<16x1xf32> to vector<16x128xf32>
    %78 = arith.addf %76, %77 : vector<16x128xf32>
    %79 = vector.broadcast %28 : vector<16x1xf32> to vector<16x128xf32>
    %80 = vector.broadcast %62 : vector<1x128xf32> to vector<16x128xf32>
    %81 = arith.mulf %79, %80 : vector<16x128xf32>
    %82 = arith.addf %78, %81 : vector<16x128xf32>
    %83 = vector.broadcast %29 : vector<16x1xf32> to vector<16x128xf32>
    %84 = arith.subf %82, %83 : vector<16x128xf32>
    %85 = vector.broadcast %64 : vector<1x128xf32> to vector<16x128xf32>
    %86 = arith.subf %84, %85 : vector<16x128xf32>
    %87 = math.absf %86 : vector<16x128xf32>
    %88 = vector.broadcast %66 : vector<1x128xf32> to vector<16x128xf32>
    %89 = arith.mulf %87, %88 : vector<16x128xf32>
    %90 = arith.addf %60, %89 : vector<16x128xf32>
    %c2_i32 = arith.constant 2 : i32
    %91 = arith.index_cast %c2_i32 : i32 to index
    %c0_18 = arith.constant 0 : index
    %92 = vector.load %arg6[%91, %c0_18] : memref<20x128xf32, #tpu.memory_space<vmem>>, vector<1x128xf32>
    %93 = arith.index_cast %c2_i32 : i32 to index
    %c0_19 = arith.constant 0 : index
    %94 = vector.load %arg5[%93, %c0_19] : memref<20x128xf32, #tpu.memory_space<vmem>>, vector<1x128xf32>
    %95 = arith.index_cast %c2_i32 : i32 to index
    %c0_20 = arith.constant 0 : index
    %96 = vector.load %arg7[%95, %c0_20] : memref<20x128xf32, #tpu.memory_space<vmem>>, vector<1x128xf32>
    %97 = vector.broadcast %92 : vector<1x128xf32> to vector<16x128xf32>
    %98 = vector.broadcast %25 : vector<16x1xf32> to vector<16x128xf32>
    %99 = arith.subf %97, %98 : vector<16x128xf32>
    %cst_21 = arith.constant 1.000000e+00 : f32
    %100 = vector.broadcast %cst_21 : f32 to vector<16x128xf32>
    %101 = arith.divf %100, %99 : vector<16x128xf32>
    %102 = vector.broadcast %24 : vector<16x1xf32> to vector<16x128xf32>
    %103 = arith.mulf %102, %101 : vector<16x128xf32>
    %104 = vector.broadcast %26 : vector<16x1xf32> to vector<16x128xf32>
    %105 = arith.addf %103, %104 : vector<16x128xf32>
    %106 = arith.mulf %105, %101 : vector<16x128xf32>
    %107 = vector.broadcast %27 : vector<16x1xf32> to vector<16x128xf32>
    %108 = arith.addf %106, %107 : vector<16x128xf32>
    %109 = vector.broadcast %28 : vector<16x1xf32> to vector<16x128xf32>
    %110 = vector.broadcast %92 : vector<1x128xf32> to vector<16x128xf32>
    %111 = arith.mulf %109, %110 : vector<16x128xf32>
    %112 = arith.addf %108, %111 : vector<16x128xf32>
    %113 = vector.broadcast %29 : vector<16x1xf32> to vector<16x128xf32>
    %114 = arith.subf %112, %113 : vector<16x128xf32>
    %115 = vector.broadcast %94 : vector<1x128xf32> to vector<16x128xf32>
    %116 = arith.subf %114, %115 : vector<16x128xf32>
    %117 = math.absf %116 : vector<16x128xf32>
    %118 = vector.broadcast %96 : vector<1x128xf32> to vector<16x128xf32>
    %119 = arith.mulf %117, %118 : vector<16x128xf32>
    %120 = arith.addf %90, %119 : vector<16x128xf32>
    %c3_i32 = arith.constant 3 : i32
    %121 = arith.index_cast %c3_i32 : i32 to index
    %c0_22 = arith.constant 0 : index
    %122 = vector.load %arg6[%121, %c0_22] : memref<20x128xf32, #tpu.memory_space<vmem>>, vector<1x128xf32>
    %123 = arith.index_cast %c3_i32 : i32 to index
    %c0_23 = arith.constant 0 : index
    %124 = vector.load %arg5[%123, %c0_23] : memref<20x128xf32, #tpu.memory_space<vmem>>, vector<1x128xf32>
    %125 = arith.index_cast %c3_i32 : i32 to index
    %c0_24 = arith.constant 0 : index
    %126 = vector.load %arg7[%125, %c0_24] : memref<20x128xf32, #tpu.memory_space<vmem>>, vector<1x128xf32>
    %127 = vector.broadcast %122 : vector<1x128xf32> to vector<16x128xf32>
    %128 = vector.broadcast %25 : vector<16x1xf32> to vector<16x128xf32>
    %129 = arith.subf %127, %128 : vector<16x128xf32>
    %cst_25 = arith.constant 1.000000e+00 : f32
    %130 = vector.broadcast %cst_25 : f32 to vector<16x128xf32>
    %131 = arith.divf %130, %129 : vector<16x128xf32>
    %132 = vector.broadcast %24 : vector<16x1xf32> to vector<16x128xf32>
    %133 = arith.mulf %132, %131 : vector<16x128xf32>
    %134 = vector.broadcast %26 : vector<16x1xf32> to vector<16x128xf32>
    %135 = arith.addf %133, %134 : vector<16x128xf32>
    %136 = arith.mulf %135, %131 : vector<16x128xf32>
    %137 = vector.broadcast %27 : vector<16x1xf32> to vector<16x128xf32>
    %138 = arith.addf %136, %137 : vector<16x128xf32>
    %139 = vector.broadcast %28 : vector<16x1xf32> to vector<16x128xf32>
    %140 = vector.broadcast %122 : vector<1x128xf32> to vector<16x128xf32>
    %141 = arith.mulf %139, %140 : vector<16x128xf32>
    %142 = arith.addf %138, %141 : vector<16x128xf32>
    %143 = vector.broadcast %29 : vector<16x1xf32> to vector<16x128xf32>
    %144 = arith.subf %142, %143 : vector<16x128xf32>
    %145 = vector.broadcast %124 : vector<1x128xf32> to vector<16x128xf32>
    %146 = arith.subf %144, %145 : vector<16x128xf32>
    %147 = math.absf %146 : vector<16x128xf32>
    %148 = vector.broadcast %126 : vector<1x128xf32> to vector<16x128xf32>
    %149 = arith.mulf %147, %148 : vector<16x128xf32>
    %150 = arith.addf %120, %149 : vector<16x128xf32>
    %c4_i32 = arith.constant 4 : i32
    %151 = arith.index_cast %c4_i32 : i32 to index
    %c0_26 = arith.constant 0 : index
    %152 = vector.load %arg6[%151, %c0_26] : memref<20x128xf32, #tpu.memory_space<vmem>>, vector<1x128xf32>
    %153 = arith.index_cast %c4_i32 : i32 to index
    %c0_27 = arith.constant 0 : index
    %154 = vector.load %arg5[%153, %c0_27] : memref<20x128xf32, #tpu.memory_space<vmem>>, vector<1x128xf32>
    %155 = arith.index_cast %c4_i32 : i32 to index
    %c0_28 = arith.constant 0 : index
    %156 = vector.load %arg7[%155, %c0_28] : memref<20x128xf32, #tpu.memory_space<vmem>>, vector<1x128xf32>
    %157 = vector.broadcast %152 : vector<1x128xf32> to vector<16x128xf32>
    %158 = vector.broadcast %25 : vector<16x1xf32> to vector<16x128xf32>
    %159 = arith.subf %157, %158 : vector<16x128xf32>
    %cst_29 = arith.constant 1.000000e+00 : f32
    %160 = vector.broadcast %cst_29 : f32 to vector<16x128xf32>
    %161 = arith.divf %160, %159 : vector<16x128xf32>
    %162 = vector.broadcast %24 : vector<16x1xf32> to vector<16x128xf32>
    %163 = arith.mulf %162, %161 : vector<16x128xf32>
    %164 = vector.broadcast %26 : vector<16x1xf32> to vector<16x128xf32>
    %165 = arith.addf %163, %164 : vector<16x128xf32>
    %166 = arith.mulf %165, %161 : vector<16x128xf32>
    %167 = vector.broadcast %27 : vector<16x1xf32> to vector<16x128xf32>
    %168 = arith.addf %166, %167 : vector<16x128xf32>
    %169 = vector.broadcast %28 : vector<16x1xf32> to vector<16x128xf32>
    %170 = vector.broadcast %152 : vector<1x128xf32> to vector<16x128xf32>
    %171 = arith.mulf %169, %170 : vector<16x128xf32>
    %172 = arith.addf %168, %171 : vector<16x128xf32>
    %173 = vector.broadcast %29 : vector<16x1xf32> to vector<16x128xf32>
    %174 = arith.subf %172, %173 : vector<16x128xf32>
    %175 = vector.broadcast %154 : vector<1x128xf32> to vector<16x128xf32>
    %176 = arith.subf %174, %175 : vector<16x128xf32>
    %177 = math.absf %176 : vector<16x128xf32>
    %178 = vector.broadcast %156 : vector<1x128xf32> to vector<16x128xf32>
    %179 = arith.mulf %177, %178 : vector<16x128xf32>
    %180 = arith.addf %150, %179 : vector<16x128xf32>
    %c5_i32 = arith.constant 5 : i32
    %181 = arith.index_cast %c5_i32 : i32 to index
    %c0_30 = arith.constant 0 : index
    %182 = vector.load %arg6[%181, %c0_30] : memref<20x128xf32, #tpu.memory_space<vmem>>, vector<1x128xf32>
    %183 = arith.index_cast %c5_i32 : i32 to index
    %c0_31 = arith.constant 0 : index
    %184 = vector.load %arg5[%183, %c0_31] : memref<20x128xf32, #tpu.memory_space<vmem>>, vector<1x128xf32>
    %185 = arith.index_cast %c5_i32 : i32 to index
    %c0_32 = arith.constant 0 : index
    %186 = vector.load %arg7[%185, %c0_32] : memref<20x128xf32, #tpu.memory_space<vmem>>, vector<1x128xf32>
    %187 = vector.broadcast %182 : vector<1x128xf32> to vector<16x128xf32>
    %188 = vector.broadcast %25 : vector<16x1xf32> to vector<16x128xf32>
    %189 = arith.subf %187, %188 : vector<16x128xf32>
    %cst_33 = arith.constant 1.000000e+00 : f32
    %190 = vector.broadcast %cst_33 : f32 to vector<16x128xf32>
    %191 = arith.divf %190, %189 : vector<16x128xf32>
    %192 = vector.broadcast %24 : vector<16x1xf32> to vector<16x128xf32>
    %193 = arith.mulf %192, %191 : vector<16x128xf32>
    %194 = vector.broadcast %26 : vector<16x1xf32> to vector<16x128xf32>
    %195 = arith.addf %193, %194 : vector<16x128xf32>
    %196 = arith.mulf %195, %191 : vector<16x128xf32>
    %197 = vector.broadcast %27 : vector<16x1xf32> to vector<16x128xf32>
    %198 = arith.addf %196, %197 : vector<16x128xf32>
    %199 = vector.broadcast %28 : vector<16x1xf32> to vector<16x128xf32>
    %200 = vector.broadcast %182 : vector<1x128xf32> to vector<16x128xf32>
    %201 = arith.mulf %199, %200 : vector<16x128xf32>
    %202 = arith.addf %198, %201 : vector<16x128xf32>
    %203 = vector.broadcast %29 : vector<16x1xf32> to vector<16x128xf32>
    %204 = arith.subf %202, %203 : vector<16x128xf32>
    %205 = vector.broadcast %184 : vector<1x128xf32> to vector<16x128xf32>
    %206 = arith.subf %204, %205 : vector<16x128xf32>
    %207 = math.absf %206 : vector<16x128xf32>
    %208 = vector.broadcast %186 : vector<1x128xf32> to vector<16x128xf32>
    %209 = arith.mulf %207, %208 : vector<16x128xf32>
    %210 = arith.addf %180, %209 : vector<16x128xf32>
    %c6_i32 = arith.constant 6 : i32
    %211 = arith.index_cast %c6_i32 : i32 to index
    %c0_34 = arith.constant 0 : index
    %212 = vector.load %arg6[%211, %c0_34] : memref<20x128xf32, #tpu.memory_space<vmem>>, vector<1x128xf32>
    %213 = arith.index_cast %c6_i32 : i32 to index
    %c0_35 = arith.constant 0 : index
    %214 = vector.load %arg5[%213, %c0_35] : memref<20x128xf32, #tpu.memory_space<vmem>>, vector<1x128xf32>
    %215 = arith.index_cast %c6_i32 : i32 to index
    %c0_36 = arith.constant 0 : index
    %216 = vector.load %arg7[%215, %c0_36] : memref<20x128xf32, #tpu.memory_space<vmem>>, vector<1x128xf32>
    %217 = vector.broadcast %212 : vector<1x128xf32> to vector<16x128xf32>
    %218 = vector.broadcast %25 : vector<16x1xf32> to vector<16x128xf32>
    %219 = arith.subf %217, %218 : vector<16x128xf32>
    %cst_37 = arith.constant 1.000000e+00 : f32
    %220 = vector.broadcast %cst_37 : f32 to vector<16x128xf32>
    %221 = arith.divf %220, %219 : vector<16x128xf32>
    %222 = vector.broadcast %24 : vector<16x1xf32> to vector<16x128xf32>
    %223 = arith.mulf %222, %221 : vector<16x128xf32>
    %224 = vector.broadcast %26 : vector<16x1xf32> to vector<16x128xf32>
    %225 = arith.addf %223, %224 : vector<16x128xf32>
    %226 = arith.mulf %225, %221 : vector<16x128xf32>
    %227 = vector.broadcast %27 : vector<16x1xf32> to vector<16x128xf32>
    %228 = arith.addf %226, %227 : vector<16x128xf32>
    %229 = vector.broadcast %28 : vector<16x1xf32> to vector<16x128xf32>
    %230 = vector.broadcast %212 : vector<1x128xf32> to vector<16x128xf32>
    %231 = arith.mulf %229, %230 : vector<16x128xf32>
    %232 = arith.addf %228, %231 : vector<16x128xf32>
    %233 = vector.broadcast %29 : vector<16x1xf32> to vector<16x128xf32>
    %234 = arith.subf %232, %233 : vector<16x128xf32>
    %235 = vector.broadcast %214 : vector<1x128xf32> to vector<16x128xf32>
    %236 = arith.subf %234, %235 : vector<16x128xf32>
    %237 = math.absf %236 : vector<16x128xf32>
    %238 = vector.broadcast %216 : vector<1x128xf32> to vector<16x128xf32>
    %239 = arith.mulf %237, %238 : vector<16x128xf32>
    %240 = arith.addf %210, %239 : vector<16x128xf32>
    %c7_i32 = arith.constant 7 : i32
    %241 = arith.index_cast %c7_i32 : i32 to index
    %c0_38 = arith.constant 0 : index
    %242 = vector.load %arg6[%241, %c0_38] : memref<20x128xf32, #tpu.memory_space<vmem>>, vector<1x128xf32>
    %243 = arith.index_cast %c7_i32 : i32 to index
    %c0_39 = arith.constant 0 : index
    %244 = vector.load %arg5[%243, %c0_39] : memref<20x128xf32, #tpu.memory_space<vmem>>, vector<1x128xf32>
    %245 = arith.index_cast %c7_i32 : i32 to index
    %c0_40 = arith.constant 0 : index
    %246 = vector.load %arg7[%245, %c0_40] : memref<20x128xf32, #tpu.memory_space<vmem>>, vector<1x128xf32>
    %247 = vector.broadcast %242 : vector<1x128xf32> to vector<16x128xf32>
    %248 = vector.broadcast %25 : vector<16x1xf32> to vector<16x128xf32>
    %249 = arith.subf %247, %248 : vector<16x128xf32>
    %cst_41 = arith.constant 1.000000e+00 : f32
    %250 = vector.broadcast %cst_41 : f32 to vector<16x128xf32>
    %251 = arith.divf %250, %249 : vector<16x128xf32>
    %252 = vector.broadcast %24 : vector<16x1xf32> to vector<16x128xf32>
    %253 = arith.mulf %252, %251 : vector<16x128xf32>
    %254 = vector.broadcast %26 : vector<16x1xf32> to vector<16x128xf32>
    %255 = arith.addf %253, %254 : vector<16x128xf32>
    %256 = arith.mulf %255, %251 : vector<16x128xf32>
    %257 = vector.broadcast %27 : vector<16x1xf32> to vector<16x128xf32>
    %258 = arith.addf %256, %257 : vector<16x128xf32>
    %259 = vector.broadcast %28 : vector<16x1xf32> to vector<16x128xf32>
    %260 = vector.broadcast %242 : vector<1x128xf32> to vector<16x128xf32>
    %261 = arith.mulf %259, %260 : vector<16x128xf32>
    %262 = arith.addf %258, %261 : vector<16x128xf32>
    %263 = vector.broadcast %29 : vector<16x1xf32> to vector<16x128xf32>
    %264 = arith.subf %262, %263 : vector<16x128xf32>
    %265 = vector.broadcast %244 : vector<1x128xf32> to vector<16x128xf32>
    %266 = arith.subf %264, %265 : vector<16x128xf32>
    %267 = math.absf %266 : vector<16x128xf32>
    %268 = vector.broadcast %246 : vector<1x128xf32> to vector<16x128xf32>
    %269 = arith.mulf %267, %268 : vector<16x128xf32>
    %270 = arith.addf %240, %269 : vector<16x128xf32>
    %c8_i32 = arith.constant 8 : i32
    %271 = arith.index_cast %c8_i32 : i32 to index
    %c0_42 = arith.constant 0 : index
    %272 = vector.load %arg6[%271, %c0_42] : memref<20x128xf32, #tpu.memory_space<vmem>>, vector<1x128xf32>
    %273 = arith.index_cast %c8_i32 : i32 to index
    %c0_43 = arith.constant 0 : index
    %274 = vector.load %arg5[%273, %c0_43] : memref<20x128xf32, #tpu.memory_space<vmem>>, vector<1x128xf32>
    %275 = arith.index_cast %c8_i32 : i32 to index
    %c0_44 = arith.constant 0 : index
    %276 = vector.load %arg7[%275, %c0_44] : memref<20x128xf32, #tpu.memory_space<vmem>>, vector<1x128xf32>
    %277 = vector.broadcast %272 : vector<1x128xf32> to vector<16x128xf32>
    %278 = vector.broadcast %25 : vector<16x1xf32> to vector<16x128xf32>
    %279 = arith.subf %277, %278 : vector<16x128xf32>
    %cst_45 = arith.constant 1.000000e+00 : f32
    %280 = vector.broadcast %cst_45 : f32 to vector<16x128xf32>
    %281 = arith.divf %280, %279 : vector<16x128xf32>
    %282 = vector.broadcast %24 : vector<16x1xf32> to vector<16x128xf32>
    %283 = arith.mulf %282, %281 : vector<16x128xf32>
    %284 = vector.broadcast %26 : vector<16x1xf32> to vector<16x128xf32>
    %285 = arith.addf %283, %284 : vector<16x128xf32>
    %286 = arith.mulf %285, %281 : vector<16x128xf32>
    %287 = vector.broadcast %27 : vector<16x1xf32> to vector<16x128xf32>
    %288 = arith.addf %286, %287 : vector<16x128xf32>
    %289 = vector.broadcast %28 : vector<16x1xf32> to vector<16x128xf32>
    %290 = vector.broadcast %272 : vector<1x128xf32> to vector<16x128xf32>
    %291 = arith.mulf %289, %290 : vector<16x128xf32>
    %292 = arith.addf %288, %291 : vector<16x128xf32>
    %293 = vector.broadcast %29 : vector<16x1xf32> to vector<16x128xf32>
    %294 = arith.subf %292, %293 : vector<16x128xf32>
    %295 = vector.broadcast %274 : vector<1x128xf32> to vector<16x128xf32>
    %296 = arith.subf %294, %295 : vector<16x128xf32>
    %297 = math.absf %296 : vector<16x128xf32>
    %298 = vector.broadcast %276 : vector<1x128xf32> to vector<16x128xf32>
    %299 = arith.mulf %297, %298 : vector<16x128xf32>
    %300 = arith.addf %270, %299 : vector<16x128xf32>
    %c9_i32 = arith.constant 9 : i32
    %301 = arith.index_cast %c9_i32 : i32 to index
    %c0_46 = arith.constant 0 : index
    %302 = vector.load %arg6[%301, %c0_46] : memref<20x128xf32, #tpu.memory_space<vmem>>, vector<1x128xf32>
    %303 = arith.index_cast %c9_i32 : i32 to index
    %c0_47 = arith.constant 0 : index
    %304 = vector.load %arg5[%303, %c0_47] : memref<20x128xf32, #tpu.memory_space<vmem>>, vector<1x128xf32>
    %305 = arith.index_cast %c9_i32 : i32 to index
    %c0_48 = arith.constant 0 : index
    %306 = vector.load %arg7[%305, %c0_48] : memref<20x128xf32, #tpu.memory_space<vmem>>, vector<1x128xf32>
    %307 = vector.broadcast %302 : vector<1x128xf32> to vector<16x128xf32>
    %308 = vector.broadcast %25 : vector<16x1xf32> to vector<16x128xf32>
    %309 = arith.subf %307, %308 : vector<16x128xf32>
    %cst_49 = arith.constant 1.000000e+00 : f32
    %310 = vector.broadcast %cst_49 : f32 to vector<16x128xf32>
    %311 = arith.divf %310, %309 : vector<16x128xf32>
    %312 = vector.broadcast %24 : vector<16x1xf32> to vector<16x128xf32>
    %313 = arith.mulf %312, %311 : vector<16x128xf32>
    %314 = vector.broadcast %26 : vector<16x1xf32> to vector<16x128xf32>
    %315 = arith.addf %313, %314 : vector<16x128xf32>
    %316 = arith.mulf %315, %311 : vector<16x128xf32>
    %317 = vector.broadcast %27 : vector<16x1xf32> to vector<16x128xf32>
    %318 = arith.addf %316, %317 : vector<16x128xf32>
    %319 = vector.broadcast %28 : vector<16x1xf32> to vector<16x128xf32>
    %320 = vector.broadcast %302 : vector<1x128xf32> to vector<16x128xf32>
    %321 = arith.mulf %319, %320 : vector<16x128xf32>
    %322 = arith.addf %318, %321 : vector<16x128xf32>
    %323 = vector.broadcast %29 : vector<16x1xf32> to vector<16x128xf32>
    %324 = arith.subf %322, %323 : vector<16x128xf32>
    %325 = vector.broadcast %304 : vector<1x128xf32> to vector<16x128xf32>
    %326 = arith.subf %324, %325 : vector<16x128xf32>
    %327 = math.absf %326 : vector<16x128xf32>
    %328 = vector.broadcast %306 : vector<1x128xf32> to vector<16x128xf32>
    %329 = arith.mulf %327, %328 : vector<16x128xf32>
    %330 = arith.addf %300, %329 : vector<16x128xf32>
    %c10_i32 = arith.constant 10 : i32
    %331 = arith.index_cast %c10_i32 : i32 to index
    %c0_50 = arith.constant 0 : index
    %332 = vector.load %arg6[%331, %c0_50] : memref<20x128xf32, #tpu.memory_space<vmem>>, vector<1x128xf32>
    %333 = arith.index_cast %c10_i32 : i32 to index
    %c0_51 = arith.constant 0 : index
    %334 = vector.load %arg5[%333, %c0_51] : memref<20x128xf32, #tpu.memory_space<vmem>>, vector<1x128xf32>
    %335 = arith.index_cast %c10_i32 : i32 to index
    %c0_52 = arith.constant 0 : index
    %336 = vector.load %arg7[%335, %c0_52] : memref<20x128xf32, #tpu.memory_space<vmem>>, vector<1x128xf32>
    %337 = vector.broadcast %332 : vector<1x128xf32> to vector<16x128xf32>
    %338 = vector.broadcast %25 : vector<16x1xf32> to vector<16x128xf32>
    %339 = arith.subf %337, %338 : vector<16x128xf32>
    %cst_53 = arith.constant 1.000000e+00 : f32
    %340 = vector.broadcast %cst_53 : f32 to vector<16x128xf32>
    %341 = arith.divf %340, %339 : vector<16x128xf32>
    %342 = vector.broadcast %24 : vector<16x1xf32> to vector<16x128xf32>
    %343 = arith.mulf %342, %341 : vector<16x128xf32>
    %344 = vector.broadcast %26 : vector<16x1xf32> to vector<16x128xf32>
    %345 = arith.addf %343, %344 : vector<16x128xf32>
    %346 = arith.mulf %345, %341 : vector<16x128xf32>
    %347 = vector.broadcast %27 : vector<16x1xf32> to vector<16x128xf32>
    %348 = arith.addf %346, %347 : vector<16x128xf32>
    %349 = vector.broadcast %28 : vector<16x1xf32> to vector<16x128xf32>
    %350 = vector.broadcast %332 : vector<1x128xf32> to vector<16x128xf32>
    %351 = arith.mulf %349, %350 : vector<16x128xf32>
    %352 = arith.addf %348, %351 : vector<16x128xf32>
    %353 = vector.broadcast %29 : vector<16x1xf32> to vector<16x128xf32>
    %354 = arith.subf %352, %353 : vector<16x128xf32>
    %355 = vector.broadcast %334 : vector<1x128xf32> to vector<16x128xf32>
    %356 = arith.subf %354, %355 : vector<16x128xf32>
    %357 = math.absf %356 : vector<16x128xf32>
    %358 = vector.broadcast %336 : vector<1x128xf32> to vector<16x128xf32>
    %359 = arith.mulf %357, %358 : vector<16x128xf32>
    %360 = arith.addf %330, %359 : vector<16x128xf32>
    %c11_i32 = arith.constant 11 : i32
    %361 = arith.index_cast %c11_i32 : i32 to index
    %c0_54 = arith.constant 0 : index
    %362 = vector.load %arg6[%361, %c0_54] : memref<20x128xf32, #tpu.memory_space<vmem>>, vector<1x128xf32>
    %363 = arith.index_cast %c11_i32 : i32 to index
    %c0_55 = arith.constant 0 : index
    %364 = vector.load %arg5[%363, %c0_55] : memref<20x128xf32, #tpu.memory_space<vmem>>, vector<1x128xf32>
    %365 = arith.index_cast %c11_i32 : i32 to index
    %c0_56 = arith.constant 0 : index
    %366 = vector.load %arg7[%365, %c0_56] : memref<20x128xf32, #tpu.memory_space<vmem>>, vector<1x128xf32>
    %367 = vector.broadcast %362 : vector<1x128xf32> to vector<16x128xf32>
    %368 = vector.broadcast %25 : vector<16x1xf32> to vector<16x128xf32>
    %369 = arith.subf %367, %368 : vector<16x128xf32>
    %cst_57 = arith.constant 1.000000e+00 : f32
    %370 = vector.broadcast %cst_57 : f32 to vector<16x128xf32>
    %371 = arith.divf %370, %369 : vector<16x128xf32>
    %372 = vector.broadcast %24 : vector<16x1xf32> to vector<16x128xf32>
    %373 = arith.mulf %372, %371 : vector<16x128xf32>
    %374 = vector.broadcast %26 : vector<16x1xf32> to vector<16x128xf32>
    %375 = arith.addf %373, %374 : vector<16x128xf32>
    %376 = arith.mulf %375, %371 : vector<16x128xf32>
    %377 = vector.broadcast %27 : vector<16x1xf32> to vector<16x128xf32>
    %378 = arith.addf %376, %377 : vector<16x128xf32>
    %379 = vector.broadcast %28 : vector<16x1xf32> to vector<16x128xf32>
    %380 = vector.broadcast %362 : vector<1x128xf32> to vector<16x128xf32>
    %381 = arith.mulf %379, %380 : vector<16x128xf32>
    %382 = arith.addf %378, %381 : vector<16x128xf32>
    %383 = vector.broadcast %29 : vector<16x1xf32> to vector<16x128xf32>
    %384 = arith.subf %382, %383 : vector<16x128xf32>
    %385 = vector.broadcast %364 : vector<1x128xf32> to vector<16x128xf32>
    %386 = arith.subf %384, %385 : vector<16x128xf32>
    %387 = math.absf %386 : vector<16x128xf32>
    %388 = vector.broadcast %366 : vector<1x128xf32> to vector<16x128xf32>
    %389 = arith.mulf %387, %388 : vector<16x128xf32>
    %390 = arith.addf %360, %389 : vector<16x128xf32>
    %c12_i32 = arith.constant 12 : i32
    %391 = arith.index_cast %c12_i32 : i32 to index
    %c0_58 = arith.constant 0 : index
    %392 = vector.load %arg6[%391, %c0_58] : memref<20x128xf32, #tpu.memory_space<vmem>>, vector<1x128xf32>
    %393 = arith.index_cast %c12_i32 : i32 to index
    %c0_59 = arith.constant 0 : index
    %394 = vector.load %arg5[%393, %c0_59] : memref<20x128xf32, #tpu.memory_space<vmem>>, vector<1x128xf32>
    %395 = arith.index_cast %c12_i32 : i32 to index
    %c0_60 = arith.constant 0 : index
    %396 = vector.load %arg7[%395, %c0_60] : memref<20x128xf32, #tpu.memory_space<vmem>>, vector<1x128xf32>
    %397 = vector.broadcast %392 : vector<1x128xf32> to vector<16x128xf32>
    %398 = vector.broadcast %25 : vector<16x1xf32> to vector<16x128xf32>
    %399 = arith.subf %397, %398 : vector<16x128xf32>
    %cst_61 = arith.constant 1.000000e+00 : f32
    %400 = vector.broadcast %cst_61 : f32 to vector<16x128xf32>
    %401 = arith.divf %400, %399 : vector<16x128xf32>
    %402 = vector.broadcast %24 : vector<16x1xf32> to vector<16x128xf32>
    %403 = arith.mulf %402, %401 : vector<16x128xf32>
    %404 = vector.broadcast %26 : vector<16x1xf32> to vector<16x128xf32>
    %405 = arith.addf %403, %404 : vector<16x128xf32>
    %406 = arith.mulf %405, %401 : vector<16x128xf32>
    %407 = vector.broadcast %27 : vector<16x1xf32> to vector<16x128xf32>
    %408 = arith.addf %406, %407 : vector<16x128xf32>
    %409 = vector.broadcast %28 : vector<16x1xf32> to vector<16x128xf32>
    %410 = vector.broadcast %392 : vector<1x128xf32> to vector<16x128xf32>
    %411 = arith.mulf %409, %410 : vector<16x128xf32>
    %412 = arith.addf %408, %411 : vector<16x128xf32>
    %413 = vector.broadcast %29 : vector<16x1xf32> to vector<16x128xf32>
    %414 = arith.subf %412, %413 : vector<16x128xf32>
    %415 = vector.broadcast %394 : vector<1x128xf32> to vector<16x128xf32>
    %416 = arith.subf %414, %415 : vector<16x128xf32>
    %417 = math.absf %416 : vector<16x128xf32>
    %418 = vector.broadcast %396 : vector<1x128xf32> to vector<16x128xf32>
    %419 = arith.mulf %417, %418 : vector<16x128xf32>
    %420 = arith.addf %390, %419 : vector<16x128xf32>
    %c13_i32 = arith.constant 13 : i32
    %421 = arith.index_cast %c13_i32 : i32 to index
    %c0_62 = arith.constant 0 : index
    %422 = vector.load %arg6[%421, %c0_62] : memref<20x128xf32, #tpu.memory_space<vmem>>, vector<1x128xf32>
    %423 = arith.index_cast %c13_i32 : i32 to index
    %c0_63 = arith.constant 0 : index
    %424 = vector.load %arg5[%423, %c0_63] : memref<20x128xf32, #tpu.memory_space<vmem>>, vector<1x128xf32>
    %425 = arith.index_cast %c13_i32 : i32 to index
    %c0_64 = arith.constant 0 : index
    %426 = vector.load %arg7[%425, %c0_64] : memref<20x128xf32, #tpu.memory_space<vmem>>, vector<1x128xf32>
    %427 = vector.broadcast %422 : vector<1x128xf32> to vector<16x128xf32>
    %428 = vector.broadcast %25 : vector<16x1xf32> to vector<16x128xf32>
    %429 = arith.subf %427, %428 : vector<16x128xf32>
    %cst_65 = arith.constant 1.000000e+00 : f32
    %430 = vector.broadcast %cst_65 : f32 to vector<16x128xf32>
    %431 = arith.divf %430, %429 : vector<16x128xf32>
    %432 = vector.broadcast %24 : vector<16x1xf32> to vector<16x128xf32>
    %433 = arith.mulf %432, %431 : vector<16x128xf32>
    %434 = vector.broadcast %26 : vector<16x1xf32> to vector<16x128xf32>
    %435 = arith.addf %433, %434 : vector<16x128xf32>
    %436 = arith.mulf %435, %431 : vector<16x128xf32>
    %437 = vector.broadcast %27 : vector<16x1xf32> to vector<16x128xf32>
    %438 = arith.addf %436, %437 : vector<16x128xf32>
    %439 = vector.broadcast %28 : vector<16x1xf32> to vector<16x128xf32>
    %440 = vector.broadcast %422 : vector<1x128xf32> to vector<16x128xf32>
    %441 = arith.mulf %439, %440 : vector<16x128xf32>
    %442 = arith.addf %438, %441 : vector<16x128xf32>
    %443 = vector.broadcast %29 : vector<16x1xf32> to vector<16x128xf32>
    %444 = arith.subf %442, %443 : vector<16x128xf32>
    %445 = vector.broadcast %424 : vector<1x128xf32> to vector<16x128xf32>
    %446 = arith.subf %444, %445 : vector<16x128xf32>
    %447 = math.absf %446 : vector<16x128xf32>
    %448 = vector.broadcast %426 : vector<1x128xf32> to vector<16x128xf32>
    %449 = arith.mulf %447, %448 : vector<16x128xf32>
    %450 = arith.addf %420, %449 : vector<16x128xf32>
    %c14_i32 = arith.constant 14 : i32
    %451 = arith.index_cast %c14_i32 : i32 to index
    %c0_66 = arith.constant 0 : index
    %452 = vector.load %arg6[%451, %c0_66] : memref<20x128xf32, #tpu.memory_space<vmem>>, vector<1x128xf32>
    %453 = arith.index_cast %c14_i32 : i32 to index
    %c0_67 = arith.constant 0 : index
    %454 = vector.load %arg5[%453, %c0_67] : memref<20x128xf32, #tpu.memory_space<vmem>>, vector<1x128xf32>
    %455 = arith.index_cast %c14_i32 : i32 to index
    %c0_68 = arith.constant 0 : index
    %456 = vector.load %arg7[%455, %c0_68] : memref<20x128xf32, #tpu.memory_space<vmem>>, vector<1x128xf32>
    %457 = vector.broadcast %452 : vector<1x128xf32> to vector<16x128xf32>
    %458 = vector.broadcast %25 : vector<16x1xf32> to vector<16x128xf32>
    %459 = arith.subf %457, %458 : vector<16x128xf32>
    %cst_69 = arith.constant 1.000000e+00 : f32
    %460 = vector.broadcast %cst_69 : f32 to vector<16x128xf32>
    %461 = arith.divf %460, %459 : vector<16x128xf32>
    %462 = vector.broadcast %24 : vector<16x1xf32> to vector<16x128xf32>
    %463 = arith.mulf %462, %461 : vector<16x128xf32>
    %464 = vector.broadcast %26 : vector<16x1xf32> to vector<16x128xf32>
    %465 = arith.addf %463, %464 : vector<16x128xf32>
    %466 = arith.mulf %465, %461 : vector<16x128xf32>
    %467 = vector.broadcast %27 : vector<16x1xf32> to vector<16x128xf32>
    %468 = arith.addf %466, %467 : vector<16x128xf32>
    %469 = vector.broadcast %28 : vector<16x1xf32> to vector<16x128xf32>
    %470 = vector.broadcast %452 : vector<1x128xf32> to vector<16x128xf32>
    %471 = arith.mulf %469, %470 : vector<16x128xf32>
    %472 = arith.addf %468, %471 : vector<16x128xf32>
    %473 = vector.broadcast %29 : vector<16x1xf32> to vector<16x128xf32>
    %474 = arith.subf %472, %473 : vector<16x128xf32>
    %475 = vector.broadcast %454 : vector<1x128xf32> to vector<16x128xf32>
    %476 = arith.subf %474, %475 : vector<16x128xf32>
    %477 = math.absf %476 : vector<16x128xf32>
    %478 = vector.broadcast %456 : vector<1x128xf32> to vector<16x128xf32>
    %479 = arith.mulf %477, %478 : vector<16x128xf32>
    %480 = arith.addf %450, %479 : vector<16x128xf32>
    %c15_i32 = arith.constant 15 : i32
    %481 = arith.index_cast %c15_i32 : i32 to index
    %c0_70 = arith.constant 0 : index
    %482 = vector.load %arg6[%481, %c0_70] : memref<20x128xf32, #tpu.memory_space<vmem>>, vector<1x128xf32>
    %483 = arith.index_cast %c15_i32 : i32 to index
    %c0_71 = arith.constant 0 : index
    %484 = vector.load %arg5[%483, %c0_71] : memref<20x128xf32, #tpu.memory_space<vmem>>, vector<1x128xf32>
    %485 = arith.index_cast %c15_i32 : i32 to index
    %c0_72 = arith.constant 0 : index
    %486 = vector.load %arg7[%485, %c0_72] : memref<20x128xf32, #tpu.memory_space<vmem>>, vector<1x128xf32>
    %487 = vector.broadcast %482 : vector<1x128xf32> to vector<16x128xf32>
    %488 = vector.broadcast %25 : vector<16x1xf32> to vector<16x128xf32>
    %489 = arith.subf %487, %488 : vector<16x128xf32>
    %cst_73 = arith.constant 1.000000e+00 : f32
    %490 = vector.broadcast %cst_73 : f32 to vector<16x128xf32>
    %491 = arith.divf %490, %489 : vector<16x128xf32>
    %492 = vector.broadcast %24 : vector<16x1xf32> to vector<16x128xf32>
    %493 = arith.mulf %492, %491 : vector<16x128xf32>
    %494 = vector.broadcast %26 : vector<16x1xf32> to vector<16x128xf32>
    %495 = arith.addf %493, %494 : vector<16x128xf32>
    %496 = arith.mulf %495, %491 : vector<16x128xf32>
    %497 = vector.broadcast %27 : vector<16x1xf32> to vector<16x128xf32>
    %498 = arith.addf %496, %497 : vector<16x128xf32>
    %499 = vector.broadcast %28 : vector<16x1xf32> to vector<16x128xf32>
    %500 = vector.broadcast %482 : vector<1x128xf32> to vector<16x128xf32>
    %501 = arith.mulf %499, %500 : vector<16x128xf32>
    %502 = arith.addf %498, %501 : vector<16x128xf32>
    %503 = vector.broadcast %29 : vector<16x1xf32> to vector<16x128xf32>
    %504 = arith.subf %502, %503 : vector<16x128xf32>
    %505 = vector.broadcast %484 : vector<1x128xf32> to vector<16x128xf32>
    %506 = arith.subf %504, %505 : vector<16x128xf32>
    %507 = math.absf %506 : vector<16x128xf32>
    %508 = vector.broadcast %486 : vector<1x128xf32> to vector<16x128xf32>
    %509 = arith.mulf %507, %508 : vector<16x128xf32>
    %510 = arith.addf %480, %509 : vector<16x128xf32>
    %c16_i32 = arith.constant 16 : i32
    %511 = arith.index_cast %c16_i32 : i32 to index
    %c0_74 = arith.constant 0 : index
    %512 = vector.load %arg6[%511, %c0_74] : memref<20x128xf32, #tpu.memory_space<vmem>>, vector<1x128xf32>
    %513 = arith.index_cast %c16_i32 : i32 to index
    %c0_75 = arith.constant 0 : index
    %514 = vector.load %arg5[%513, %c0_75] : memref<20x128xf32, #tpu.memory_space<vmem>>, vector<1x128xf32>
    %515 = arith.index_cast %c16_i32 : i32 to index
    %c0_76 = arith.constant 0 : index
    %516 = vector.load %arg7[%515, %c0_76] : memref<20x128xf32, #tpu.memory_space<vmem>>, vector<1x128xf32>
    %517 = vector.broadcast %512 : vector<1x128xf32> to vector<16x128xf32>
    %518 = vector.broadcast %25 : vector<16x1xf32> to vector<16x128xf32>
    %519 = arith.subf %517, %518 : vector<16x128xf32>
    %cst_77 = arith.constant 1.000000e+00 : f32
    %520 = vector.broadcast %cst_77 : f32 to vector<16x128xf32>
    %521 = arith.divf %520, %519 : vector<16x128xf32>
    %522 = vector.broadcast %24 : vector<16x1xf32> to vector<16x128xf32>
    %523 = arith.mulf %522, %521 : vector<16x128xf32>
    %524 = vector.broadcast %26 : vector<16x1xf32> to vector<16x128xf32>
    %525 = arith.addf %523, %524 : vector<16x128xf32>
    %526 = arith.mulf %525, %521 : vector<16x128xf32>
    %527 = vector.broadcast %27 : vector<16x1xf32> to vector<16x128xf32>
    %528 = arith.addf %526, %527 : vector<16x128xf32>
    %529 = vector.broadcast %28 : vector<16x1xf32> to vector<16x128xf32>
    %530 = vector.broadcast %512 : vector<1x128xf32> to vector<16x128xf32>
    %531 = arith.mulf %529, %530 : vector<16x128xf32>
    %532 = arith.addf %528, %531 : vector<16x128xf32>
    %533 = vector.broadcast %29 : vector<16x1xf32> to vector<16x128xf32>
    %534 = arith.subf %532, %533 : vector<16x128xf32>
    %535 = vector.broadcast %514 : vector<1x128xf32> to vector<16x128xf32>
    %536 = arith.subf %534, %535 : vector<16x128xf32>
    %537 = math.absf %536 : vector<16x128xf32>
    %538 = vector.broadcast %516 : vector<1x128xf32> to vector<16x128xf32>
    %539 = arith.mulf %537, %538 : vector<16x128xf32>
    %540 = arith.addf %510, %539 : vector<16x128xf32>
    %c17_i32 = arith.constant 17 : i32
    %541 = arith.index_cast %c17_i32 : i32 to index
    %c0_78 = arith.constant 0 : index
    %542 = vector.load %arg6[%541, %c0_78] : memref<20x128xf32, #tpu.memory_space<vmem>>, vector<1x128xf32>
    %543 = arith.index_cast %c17_i32 : i32 to index
    %c0_79 = arith.constant 0 : index
    %544 = vector.load %arg5[%543, %c0_79] : memref<20x128xf32, #tpu.memory_space<vmem>>, vector<1x128xf32>
    %545 = arith.index_cast %c17_i32 : i32 to index
    %c0_80 = arith.constant 0 : index
    %546 = vector.load %arg7[%545, %c0_80] : memref<20x128xf32, #tpu.memory_space<vmem>>, vector<1x128xf32>
    %547 = vector.broadcast %542 : vector<1x128xf32> to vector<16x128xf32>
    %548 = vector.broadcast %25 : vector<16x1xf32> to vector<16x128xf32>
    %549 = arith.subf %547, %548 : vector<16x128xf32>
    %cst_81 = arith.constant 1.000000e+00 : f32
    %550 = vector.broadcast %cst_81 : f32 to vector<16x128xf32>
    %551 = arith.divf %550, %549 : vector<16x128xf32>
    %552 = vector.broadcast %24 : vector<16x1xf32> to vector<16x128xf32>
    %553 = arith.mulf %552, %551 : vector<16x128xf32>
    %554 = vector.broadcast %26 : vector<16x1xf32> to vector<16x128xf32>
    %555 = arith.addf %553, %554 : vector<16x128xf32>
    %556 = arith.mulf %555, %551 : vector<16x128xf32>
    %557 = vector.broadcast %27 : vector<16x1xf32> to vector<16x128xf32>
    %558 = arith.addf %556, %557 : vector<16x128xf32>
    %559 = vector.broadcast %28 : vector<16x1xf32> to vector<16x128xf32>
    %560 = vector.broadcast %542 : vector<1x128xf32> to vector<16x128xf32>
    %561 = arith.mulf %559, %560 : vector<16x128xf32>
    %562 = arith.addf %558, %561 : vector<16x128xf32>
    %563 = vector.broadcast %29 : vector<16x1xf32> to vector<16x128xf32>
    %564 = arith.subf %562, %563 : vector<16x128xf32>
    %565 = vector.broadcast %544 : vector<1x128xf32> to vector<16x128xf32>
    %566 = arith.subf %564, %565 : vector<16x128xf32>
    %567 = math.absf %566 : vector<16x128xf32>
    %568 = vector.broadcast %546 : vector<1x128xf32> to vector<16x128xf32>
    %569 = arith.mulf %567, %568 : vector<16x128xf32>
    %570 = arith.addf %540, %569 : vector<16x128xf32>
    %c18_i32 = arith.constant 18 : i32
    %571 = arith.index_cast %c18_i32 : i32 to index
    %c0_82 = arith.constant 0 : index
    %572 = vector.load %arg6[%571, %c0_82] : memref<20x128xf32, #tpu.memory_space<vmem>>, vector<1x128xf32>
    %573 = arith.index_cast %c18_i32 : i32 to index
    %c0_83 = arith.constant 0 : index
    %574 = vector.load %arg5[%573, %c0_83] : memref<20x128xf32, #tpu.memory_space<vmem>>, vector<1x128xf32>
    %575 = arith.index_cast %c18_i32 : i32 to index
    %c0_84 = arith.constant 0 : index
    %576 = vector.load %arg7[%575, %c0_84] : memref<20x128xf32, #tpu.memory_space<vmem>>, vector<1x128xf32>
    %577 = vector.broadcast %572 : vector<1x128xf32> to vector<16x128xf32>
    %578 = vector.broadcast %25 : vector<16x1xf32> to vector<16x128xf32>
    %579 = arith.subf %577, %578 : vector<16x128xf32>
    %cst_85 = arith.constant 1.000000e+00 : f32
    %580 = vector.broadcast %cst_85 : f32 to vector<16x128xf32>
    %581 = arith.divf %580, %579 : vector<16x128xf32>
    %582 = vector.broadcast %24 : vector<16x1xf32> to vector<16x128xf32>
    %583 = arith.mulf %582, %581 : vector<16x128xf32>
    %584 = vector.broadcast %26 : vector<16x1xf32> to vector<16x128xf32>
    %585 = arith.addf %583, %584 : vector<16x128xf32>
    %586 = arith.mulf %585, %581 : vector<16x128xf32>
    %587 = vector.broadcast %27 : vector<16x1xf32> to vector<16x128xf32>
    %588 = arith.addf %586, %587 : vector<16x128xf32>
    %589 = vector.broadcast %28 : vector<16x1xf32> to vector<16x128xf32>
    %590 = vector.broadcast %572 : vector<1x128xf32> to vector<16x128xf32>
    %591 = arith.mulf %589, %590 : vector<16x128xf32>
    %592 = arith.addf %588, %591 : vector<16x128xf32>
    %593 = vector.broadcast %29 : vector<16x1xf32> to vector<16x128xf32>
    %594 = arith.subf %592, %593 : vector<16x128xf32>
    %595 = vector.broadcast %574 : vector<1x128xf32> to vector<16x128xf32>
    %596 = arith.subf %594, %595 : vector<16x128xf32>
    %597 = math.absf %596 : vector<16x128xf32>
    %598 = vector.broadcast %576 : vector<1x128xf32> to vector<16x128xf32>
    %599 = arith.mulf %597, %598 : vector<16x128xf32>
    %600 = arith.addf %570, %599 : vector<16x128xf32>
    %c19_i32 = arith.constant 19 : i32
    %601 = arith.index_cast %c19_i32 : i32 to index
    %c0_86 = arith.constant 0 : index
    %602 = vector.load %arg6[%601, %c0_86] : memref<20x128xf32, #tpu.memory_space<vmem>>, vector<1x128xf32>
    %603 = arith.index_cast %c19_i32 : i32 to index
    %c0_87 = arith.constant 0 : index
    %604 = vector.load %arg5[%603, %c0_87] : memref<20x128xf32, #tpu.memory_space<vmem>>, vector<1x128xf32>
    %605 = arith.index_cast %c19_i32 : i32 to index
    %c0_88 = arith.constant 0 : index
    %606 = vector.load %arg7[%605, %c0_88] : memref<20x128xf32, #tpu.memory_space<vmem>>, vector<1x128xf32>
    %607 = vector.broadcast %602 : vector<1x128xf32> to vector<16x128xf32>
    %608 = vector.broadcast %25 : vector<16x1xf32> to vector<16x128xf32>
    %609 = arith.subf %607, %608 : vector<16x128xf32>
    %cst_89 = arith.constant 1.000000e+00 : f32
    %610 = vector.broadcast %cst_89 : f32 to vector<16x128xf32>
    %611 = arith.divf %610, %609 : vector<16x128xf32>
    %612 = vector.broadcast %24 : vector<16x1xf32> to vector<16x128xf32>
    %613 = arith.mulf %612, %611 : vector<16x128xf32>
    %614 = vector.broadcast %26 : vector<16x1xf32> to vector<16x128xf32>
    %615 = arith.addf %613, %614 : vector<16x128xf32>
    %616 = arith.mulf %615, %611 : vector<16x128xf32>
    %617 = vector.broadcast %27 : vector<16x1xf32> to vector<16x128xf32>
    %618 = arith.addf %616, %617 : vector<16x128xf32>
    %619 = vector.broadcast %28 : vector<16x1xf32> to vector<16x128xf32>
    %620 = vector.broadcast %602 : vector<1x128xf32> to vector<16x128xf32>
    %621 = arith.mulf %619, %620 : vector<16x128xf32>
    %622 = arith.addf %618, %621 : vector<16x128xf32>
    %623 = vector.broadcast %29 : vector<16x1xf32> to vector<16x128xf32>
    %624 = arith.subf %622, %623 : vector<16x128xf32>
    %625 = vector.broadcast %604 : vector<1x128xf32> to vector<16x128xf32>
    %626 = arith.subf %624, %625 : vector<16x128xf32>
    %627 = math.absf %626 : vector<16x128xf32>
    %628 = vector.broadcast %606 : vector<1x128xf32> to vector<16x128xf32>
    %629 = arith.mulf %627, %628 : vector<16x128xf32>
    %630 = arith.addf %600, %629 : vector<16x128xf32>
    %c20_i32 = arith.constant 20 : i32
    %cst_90 = arith.constant 3.000000e+00 : f32
    %631 = vector.broadcast %cst_90 : f32 to vector<16x1xf32>
    %632 = arith.mulf %631, %10 : vector<16x1xf32>
    %cst_91 = arith.constant 5.000000e+00 : f32
    %633 = vector.broadcast %cst_91 : f32 to vector<16x128xf32>
    %634 = arith.mulf %633, %630 : vector<16x128xf32>
    %635 = vector.broadcast %632 : vector<16x1xf32> to vector<16x128xf32>
    %636 = arith.addf %635, %634 : vector<16x128xf32>
    %cst_92 = arith.constant 2.000000e+00 : f32
    %637 = vector.broadcast %cst_92 : f32 to vector<16x128xf32>
    %638 = arith.mulf %637, %23 : vector<16x128xf32>
    %639 = arith.addf %636, %638 : vector<16x128xf32>
    %cst_93 = arith.constant 2.000000e+00 : f32
    %640 = vector.broadcast %cst_93 : f32 to vector<16x128xf32>
    %641 = arith.mulf %640, %18 : vector<16x128xf32>
    %642 = arith.addf %639, %641 : vector<16x128xf32>
    %c0_94 = arith.constant 0 : index
    %c0_95 = arith.constant 0 : index
    %643 = vector.load %arg8[%c0_94, %c0_95] : memref<16x128xf32, #tpu.memory_space<vmem>>, vector<16x128xf32>
    tpu.vector_store %arg8[%c0_94, %c0_95], %642 {strides = array<i32>} : memref<16x128xf32, #tpu.memory_space<vmem>>, vector<16x128xf32>,
    return
  }
  func.func @transform_0(%arg0: i32) -> (i32, i32) {
    %c0_i32 = arith.constant 0 : i32
    %c0_i32_0 = arith.constant 0 : i32
    return %arg0, %c0_i32 : i32, i32
  }
  func.func @transform_1(%arg0: i32) -> (i32, i32) {
    %c0_i32 = arith.constant 0 : i32
    %c0_i32_0 = arith.constant 0 : i32
    return %arg0, %c0_i32 : i32, i32
  }
  func.func @transform_2(%arg0: i32) -> (i32, i32) {
    %c0_i32 = arith.constant 0 : i32
    %c0_i32_0 = arith.constant 0 : i32
    %c0_i32_1 = arith.constant 0 : i32
    return %c0_i32, %c0_i32_0 : i32, i32
  }
  func.func @transform_3(%arg0: i32) -> (i32, i32) {
    %c0_i32 = arith.constant 0 : i32
    %c0_i32_0 = arith.constant 0 : i32
    %c0_i32_1 = arith.constant 0 : i32
    return %c0_i32, %c0_i32_0 : i32, i32
  }
  func.func @transform_4(%arg0: i32) -> (i32, i32) {
    %c0_i32 = arith.constant 0 : i32
    %c0_i32_0 = arith.constant 0 : i32
    %c0_i32_1 = arith.constant 0 : i32
    return %c0_i32, %c0_i32_0 : i32, i32
  }
  func.func @transform_5(%arg0: i32) -> (i32, i32) {
    %c0_i32 = arith.constant 0 : i32
    %c0_i32_0 = arith.constant 0 : i32
    %c0_i32_1 = arith.constant 0 : i32
    return %c0_i32, %c0_i32_0 : i32, i32
  }
  func.func @transform_6(%arg0: i32) -> (i32, i32) {
    %c0_i32 = arith.constant 0 : i32
    %c0_i32_0 = arith.constant 0 : i32
    %c0_i32_1 = arith.constant 0 : i32
    return %c0_i32, %c0_i32_0 : i32, i32
  }
  func.func @transform_7(%arg0: i32) -> (i32, i32) {
    %c0_i32 = arith.constant 0 : i32
    %c0_i32_0 = arith.constant 0 : i32
    return %arg0, %c0_i32 : i32, i32
  }
}

</mosaic_0001>

<bundles_post_ra>
// kernel: tpu_custom_call.1
= control target key start
LH: loop header
LB: loop body
LE: loop exit
PB: predicated region body
PF: predicated region fallthrough
CT: control target
= control target key end

     0   :  { %12 = vsyncpa [#allocation3], 0  ;;  %s2221_s0 = inlined_call_operand.vmem [shape: f32[16,2], index: 0, kind: input, shape index: {}]   ;;  %s2222_s1 = inlined_call_operand.vmem [shape: f32[16,8], index: 1, kind: input, shape index: {}]   ;;  %s2223_s2 = inlined_call_operand.vmem [shape: f32[1,128], index: 2, kind: input, shape index: {}]   ;;  %s2224_s3 = inlined_call_operand.vmem [shape: f32[1,128], index: 3, kind: input, shape index: {}]   ;;  %s2225_s4 = inlined_call_operand.vmem [shape: f32[20,128], index: 4, kind: input, shape index: {}]   ;;  %s2226_s5 = inlined_call_operand.vmem [shape: f32[20,128], index: 5, kind: input, shape index: {}]   ;;  %s2227_s6 = inlined_call_operand.hbm [shape: f32[20,128], index: 6, kind: input, shape index: {}]   ;;  %s2228_s7 = inlined_call_operand.hbm [shape: f32[16,128], index: 7, kind: output, shape index: {}]  }
   0x1   :  { %13 = vsyncpa [#allocation4], 0  ;;  %s1282_s24 = smov [#allocation2]   ;;  %s1234_s28 = scalar_lea.hbm %s2227_s6, 384 }
   0x2   :  { %s31_s25 = sshll.u32 %s1282_s24, 4  ;;  %p1235_p0 = scmp.ne.s32.totalorder %s2227_s6, %s1234_s28  ;;  %s32_s25 = int_to_ptr.vmem [resolvable:$true] %s31_s25 }
   0x3   :  { %p1238_p1 = scmp.lt.u32.totalorder %s1234_s28, %s2227_s6 }
   0x5   :  { %p1240_p2 = pnand %p1238_p1, %p1235_p0 }
   0x7   :  { %1243 = shalt.err (!%p1240_p2)
}
   0x8   :  { %s1244_s10 = scalar_lea.vmem %s32_s25, 384  ;;  %p1249_p4 = scmp.lt.s32.totalorder %s32_s25, %s32_s25 }
   0x9   :  { %p1245_p3 = scmp.ne.s32.totalorder %s32_s25, %s1244_s10  ;;  %p1250_p5 = scmp.lt.s32.totalorder %s1244_s10, %s1244_s10 }
   0xb   :  { %p1251_p6 = por %p1250_p5, %p1249_p4 }
   0xd   :  { %p1252_p7 = pnand %p1251_p6, %p1245_p3 }
   0xf   :  { %1255 = shalt.err (!%p1252_p7)
}
  0x10   :  { %s1283_s11 = smov 128   ;;  %s1284_s12 = smov 8  }
  0x11   :  { %37 = dma.hbm_to_vmem [thread:$0]  %s2227_s6, 384, %s32_s25, [#allocation3], %s1283_s11, %s1283_s11, %s1284_s12  }
  0x12   :  { %1278 = dma.done.wait [#allocation3], 384  }
  0x13   :  { %1279 = vsyncadd [#allocation3], 4294966912  ;;  %v1285_v0 = vmov 3   ;;  %v1286_v1 = vmov 2   ;;  %v41_v2 = vld [vmem:[%s2221_s0] sm:$0xff]  ;;  %s1287_s19 = smov 127  }
  0x14   :  { %1133 = vset.pattern.permute.xlu1 %v1285_v0  ;;  %1134 = vset.pattern.permute.xlu0 %v1286_v1  ;;  %v65_v3 = vld [vmem:[%s2222_s1] sm:$0xff]  ;;  %v42_v4 = vld [vmem:[%s2221_s0 + $0x8] sm:$0xff]  ;;  %v1288_v6 = vmov 4   ;;  %v1289_v7 = vmov 6   ;;  %v1290_v8 = vmov 5   ;;  %v1291_v9 = vmov 7  }
  0x15   :  { %45 = vrot.lane.b32.xlu0 %v41_v2, %s1287_s19  ;;  %115 = vperm.xlu1 %1133, %v65_v3   ;;  %v66_v5 = vld [vmem:[%s2222_s1 + $0x8] sm:$0xff]  ;;  %v1292_v10 = vmov 0   ;;  %v1293_v11 = vmov 1   ;;  %v1365_v18 = vld [vmem:[%s2226_s5] ss:$0 sm:$0xff] }
  0x16   :  { %v1370_v19 = vld [vmem:[%s2226_s5 + $0x1] ss:$0 sm:$0xff]  ;;  %v1375_v20 = vld [vmem:[%s2226_s5 + $0x2] ss:$0 sm:$0xff]  ;;  %v1390_v28 = vld [vmem:[%s2226_s5 + $0x3] ss:$0 sm:$0xff] }
  0x17   :  { %v1395_v30 = vld [vmem:[%s2226_s5 + $0x4] ss:$0 sm:$0xff]  ;;  %v1402_v33 = vld [vmem:[%s2226_s5 + $0x5] ss:$0 sm:$0xff]  ;;  %v1407_v34 = vld [vmem:[%s2226_s5 + $0x6] ss:$0 sm:$0xff] }
  0x18   :  { %2268 = vst [vmem:[#allocation8_spill] sm:$0xff] %v1402_v33  ;;  %2269 = vst [vmem:[#allocation9_spill] sm:$0xff] %v1407_v34  ;;  %v1412_v35 = vld [vmem:[%s2226_s5 + $0x7] ss:$0 sm:$0xff]  ;;  %v1417_v36 = vld [vmem:[%s2226_s5 + $0x8] ss:$0 sm:$0xff] }
  0x19   :  { %47 = vrot.lane.b32.xlu0 %v42_v4, %s1287_s19  ;;  %119 = vperm.xlu1 %1133, %v66_v5   ;;  %2270 = vst [vmem:[#allocation10_spill] sm:$0xff] %v1412_v35  ;;  %2271 = vst [vmem:[#allocation11_spill] sm:$0xff] %v1417_v36  ;;  %v1428_v40 = vld [vmem:[%s2226_s5 + $0x9] ss:$0 sm:$0xff]  ;;  %v1433_v41 = vld [vmem:[%s2226_s5 + $0xa] ss:$0 sm:$0xff] }
  0x1a   :  { %2272 = vst [vmem:[#allocation12_spill] sm:$0xff] %v1433_v41  ;;  %v1438_v42 = vld [vmem:[%s2226_s5 + $0xb] ss:$0 sm:$0xff]  ;;  %v1447_v45 = vld [vmem:[%s2226_s5 + $0xc] ss:$0 sm:$0xff] }
  0x1b   :  { %2273 = vst [vmem:[#allocation13_spill] sm:$0xff] %v1438_v42  ;;  %2274 = vst [vmem:[#allocation14_spill] sm:$0xff] %v1447_v45 }
  0x1d   :  { %1135 = vset.pattern.permute.xlu1 %v1286_v1  ;;  %129 = vperm.xlu0 %1134, %v65_v3  }
  0x1e   :  { %133 = vperm.xlu1 %1135, %v66_v5  }
  0x21   :  { %1137 = vset.pattern.permute.xlu0 %v1288_v6 }
  0x22   :  { %1136 = vset.pattern.permute.xlu1 %v1288_v6  ;;  %143 = vperm.xlu0 %1137, %v66_v5   ;;  %v1488_v6 = vld [vmem:[%s2226_s5 + $0xd] ss:$0 sm:$0xff] }
  0x23   :  { %139 = vperm.xlu1 %1136, %v65_v3   ;;  %2275 = vst [vmem:[#allocation15_spill] sm:$0xff] %v1488_v6 }
  0x26   :  { %1139 = vset.pattern.permute.xlu0 %v1289_v7 }
  0x27   :  { %1138 = vset.pattern.permute.xlu1 %v1290_v8  ;;  %161 = vperm.xlu0 %1139, %v65_v3  }
  0x28   :  { %151 = vperm.xlu1 %1138, %v65_v3  }
  0x2b   :  { %1142 = vset.pattern.permute.xlu0 %v1291_v9 }
  0x2c   :  { %155 = vperm.xlu1 %1138, %v66_v5   ;;  %177 = vperm.xlu0 %1142, %v66_v5  }
  0x30   :  { %1140 = vset.pattern.permute.xlu1 %v1289_v7  ;;  %1144 = vset.pattern.permute.xlu0 %v1292_v10 }
  0x31   :  { %165 = vperm.xlu1 %1140, %v66_v5   ;;  %71 = vperm.xlu0 %1144, %v65_v3  }
  0x35   :  { %1141 = vset.pattern.permute.xlu1 %v1291_v9 }
  0x36   :  { %173 = vperm.xlu1 %1141, %v65_v3  }
  0x3a   :  { %1143 = vset.pattern.permute.xlu1 %v1293_v11 }
  0x3b   :  { %90 = vperm.xlu1 %1143, %v65_v3  }
  0x3f   :  { %94 = vperm.xlu1 %1143, %v66_v5  }
  0x43   :  { %1145 = vset.pattern.permute.xlu1 %v1292_v10 }
  0x44   :  { %76 = vperm.xlu1 %1145, %v66_v5  }
  0x87   :  { %v46_v12 = vpop.permute.xlu0 %45 }
  0x88   :  { %v51_v13 = vsub.f32 %v41_v2, %v46_v12 }
  0x8a   :  { %v53_v14 = vmul.f32 1.442695, %v51_v13 }
  0x8b   :  { %v48_v15 = vpop.permute.xlu0 %47 }
  0x8c   :  { %1146 = vpow2.f32 %v53_v14  ;;  %v52_v16 = vsub.f32 %v42_v4, %v48_v15  ;;  %v1502_v14 = vld [vmem:[%s2226_s5 + $0xe] ss:$0 sm:$0xff] }
  0x8e   :  { %v55_v17 = vmul.f32 1.442695, %v52_v16 }
  0x90   :  { %1148 = vpow2.f32 %v55_v17 }
  0x94   :  { %v1377_v21 = vpop.permute.xlu1 %115 }
  0x95   :  { %v122_v22 = vsub.f32 %v1365_v18, %v1377_v21  ;;  %v205_v23 = vsub.f32 %v1370_v19, %v1377_v21  ;;  %v248_v25 = vsub.f32 %v1375_v20, %v1377_v21  ;;  %v291_v32 = vsub.f32 %v1390_v28, %v1377_v21 }
  0x96   :  { %v1147_v24 = vpop.eup %1146  ;;  %v334_v39 = vsub.f32 %v1395_v30, %v1377_v21  ;;  %v377_v44 = vsub.f32 %v1402_v33, %v1377_v21  ;;  %v420_v46 = vsub.f32 %v1407_v34, %v1377_v21  ;;  %v463_v47 = vsub.f32 %v1412_v35, %v1377_v21 }
  0x97   :  { %v57_v26 = vadd.f32 1.0, %v1147_v24  ;;  %1150 = vrcp.f32 %v122_v22  ;;  %v506_v48 = vsub.f32 %v1417_v36, %v1377_v21  ;;  %v549_v50 = vsub.f32 %v1428_v40, %v1377_v21  ;;  %v1515_v24 = vld [vmem:[%s2226_s5 + $0xf] ss:$0 sm:$0xff] }
  0x98   :  { %v1385_v27 = vpop.permute.xlu1 %119  ;;  %1152 = vrcp.f32 %v205_v23  ;;  %v592_v51 = vsub.f32 %v1433_v41, %v1377_v21  ;;  %v635_v52 = vsub.f32 %v1438_v42, %v1377_v21 }
  0x99   :  { %1154 = vrcp.f32 %v57_v26  ;;  %v123_v43 = vsub.f32 %v1365_v18, %v1385_v27  ;;  %v206_v49 = vsub.f32 %v1370_v19, %v1385_v27  ;;  %v249_v54 = vsub.f32 %v1375_v20, %v1385_v27  ;;  %v1520_v26 = vld [vmem:[%s2226_s5 + $0x10] ss:$0 sm:$0xff] }
  0x9a   :  { %v1149_v29 = vpop.eup %1148  ;;  %1156 = vrcp.f32 %v248_v25  ;;  %v292_v55 = vsub.f32 %v1390_v28, %v1385_v27  ;;  %v335_v59 = vsub.f32 %v1395_v30, %v1385_v27  ;;  %v378_v60 = vsub.f32 %v1402_v33, %v1385_v27 }
  0x9b   :  { %v58_v31 = vadd.f32 1.0, %v1149_v29  ;;  %v421_v0 = vsub.f32 %v1407_v34, %v1385_v27  ;;  %v464_v1 = vsub.f32 %v1412_v35, %v1385_v27  ;;  %v507_v5 = vsub.f32 %v1417_v36, %v1385_v27 }
  0x9c   :  { %v1421_v38 = vpop.permute.xlu0 %129  ;;  %v550_v8 = vsub.f32 %v1428_v40, %v1385_v27  ;;  %v593_v12 = vsub.f32 %v1433_v41, %v1385_v27  ;;  %v636_v13 = vsub.f32 %v1438_v42, %v1385_v27 }
  0x9d   :  { %1158 = vrcp.f32 %v58_v31  ;;  %v1419_v37 = vpop.permute.xlu1 %133 }
  0x9e   :  { %1160 = vrcp.f32 %v291_v32 }
  0x9f   :  { %1162 = vrcp.f32 %v334_v39 }
  0xa0   :  { %1164 = vrcp.f32 %v123_v43 }
  0xa1   :  { %v1151_v53 = vpop.eup %1150  ;;  %v1476_v63 = vpop.permute.xlu0 %143  ;;  %1166 = vrcp.f32 %v377_v44 }
  0xa2   :  { %v1153_v57 = vpop.eup %1152  ;;  %v1469_v58 = vpop.permute.xlu1 %139  ;;  %v136_v61 = vmul.f32 %v1151_v53, %v1421_v38  ;;  %1168 = vrcp.f32 %v206_v49 }
  0xa3   :  { %v1155_v62 = vpop.eup %1154  ;;  %v211_v2 = vmul.f32 %v1153_v57, %v1421_v38  ;;  %1170 = vrcp.f32 %v420_v46 }
  0xa4   :  { %v1157_v3 = vpop.eup %1156  ;;  %v63_v4 = vsub.f32 0.0, %v1155_v62  ;;  %v146_v7 = vadd.f32 %v1469_v58, %v136_v61  ;;  %1172 = vrcp.f32 %v249_v54 }
  0xa5   :  { %v213_v9 = vadd.f32 %v211_v2, %v1469_v58  ;;  %v254_v10 = vmul.f32 %v1157_v3, %v1421_v38  ;;  %1174 = vrcp.f32 %v292_v55 }
  0xa6   :  { %v1015_v11 = vmul.f32 3.0, %v63_v4  ;;  %1176 = vrcp.f32 %v335_v59  ;;  %v148_v29 = vmul.f32 %v1151_v53, %v146_v7  ;;  %v1523_v39 = vpop.permute.xlu0 %161 }
  0xa7   :  { %v1159_v15 = vpop.eup %1158  ;;  %v1504_v16 = vpop.permute.xlu1 %151  ;;  %v256_v31 = vadd.f32 %v254_v10, %v1469_v58  ;;  %1178 = vrcp.f32 %v378_v60  ;;  %v215_v46 = vmul.f32 %v1153_v57, %v213_v9  ;;  %v168_v57 = vmul.f32 %v1365_v18, %v1523_v39 }
  0xa8   :  { %1021 = vperm.xlu1 %1145, %v1015_v11   ;;  %v64_v25 = vsub.f32 0.0, %v1159_v15  ;;  %v1161_v32 = vpop.eup %1160  ;;  %1180 = vrcp.f32 %v463_v47  ;;  %v158_v47 = vadd.f32 %v1504_v16, %v148_v29  ;;  %v219_v7 = vmul.f32 %v1370_v19, %v1523_v39 }
  0xa9   :  { %v258_v55 = vmul.f32 %v1157_v3, %v256_v31  ;;  %v1163_v53 = vpop.eup %1162  ;;  %1182 = vrcp.f32 %v421_v0  ;;  %v297_v62 = vmul.f32 %v1161_v32, %v1421_v38  ;;  %v217_v4 = vadd.f32 %v215_v46, %v1504_v16 }
  0xaa   :  { %v1016_v49 = vmul.f32 3.0, %v64_v25  ;;  %v1538_v2 = vpop.eup %1164  ;;  %1184 = vrcp.f32 %v464_v1  ;;  %v340_v3 = vmul.f32 %v1163_v53, %v1421_v38  ;;  %v262_v11 = vmul.f32 %v1375_v20, %v1523_v39 }
  0xab   :  { %v1531_v59 = vpop.permute.xlu1 %155  ;;  %v1167_v0 = vpop.eup %1166  ;;  %1186 = vrcp.f32 %v506_v48  ;;  %v299_v9 = vadd.f32 %v297_v62, %v1469_v58  ;;  %v260_v10 = vadd.f32 %v258_v55, %v1504_v16  ;;  %v305_v46 = vmul.f32 %v1390_v28, %v1523_v39  ;;  %v1571_v62 = vld [vmem:[%s2226_s5 + $0x11] ss:$0 sm:$0xff] }
  0xac   :  { %1026 = vperm.xlu0 %1144, %v1016_v49   ;;  %v1551_v1 = vpop.eup %1168  ;;  %v342_v15 = vadd.f32 %v340_v3, %v1469_v58  ;;  %v383_v25 = vmul.f32 %v1167_v0, %v1421_v38  ;;  %1188 = vrcp.f32 %v507_v5  ;;  %v170_v3 = vadd.f32 %v168_v57, %v158_v47 }
  0xad   :  { %v1558_v29 = vpop.eup %1170  ;;  %v301_v31 = vmul.f32 %v1161_v32, %v299_v9  ;;  %v348_v5 = vmul.f32 %v1395_v30, %v1523_v39  ;;  %1190 = vrcp.f32 %v549_v50  ;;  %v1584_v9 = vld [vmem:[%s2226_s5 + $0x12] ss:$0 sm:$0xff]  ;;  %v221_v44 = vadd.f32 %v219_v7, %v217_v4  ;;  %v1597_v50 = vld [vmem:[%s2226_s5 + $0x13] ss:$0 sm:$0xff] }
  0xae   :  { %v1564_v49 = vpop.eup %1172  ;;  %v344_v60 = vmul.f32 %v1163_v53, %v342_v15  ;;  %v385_v48 = vadd.f32 %v383_v25, %v1469_v58  ;;  %v426_v53 = vmul.f32 %v1558_v29, %v1421_v38  ;;  %1192 = vrcp.f32 %v550_v8 }
  0xaf   :  { %v1576_v32 = vpop.eup %1174  ;;  %v303_v47 = vadd.f32 %v301_v31, %v1504_v16  ;;  %v264_v15 = vadd.f32 %v262_v11, %v260_v10  ;;  %1194 = vrcp.f32 %v592_v51  ;;  %v391_v8 = vmul.f32 %v1402_v33, %v1523_v39 }
  0xb0   :  { %v1566_v55 = vpop.permute.xlu1 %165  ;;  %v1589_v57 = vpop.eup %1176  ;;  %v346_v25 = vadd.f32 %v344_v60, %v1504_v16  ;;  %v387_v4 = vmul.f32 %v1167_v0, %v385_v48  ;;  %1196 = vrcp.f32 %v593_v12  ;;  %v1624_v48 = vld [vmem:[%s2225_s4] ss:$0 sm:$0xff]  ;;  %v1634_v12 = vld [vmem:[%s2225_s4 + $0x2] ss:$0 sm:$0xff]  ;;  %v1651_v60 = vld [vmem:[%s2225_s4 + $0x3] ss:$0 sm:$0xff] }
  0xb1   :  { %v1600_v7 = vpop.eup %1178  ;;  %v307_v61 = vadd.f32 %v305_v46, %v303_v47  ;;  %v1629_v46 = vld [vmem:[%s2225_s4 + $0x1] ss:$0 sm:$0xff]  ;;  %2279 = vst [vmem:[#allocation19_spill] sm:$0xff] %v1634_v12  ;;  %1198 = vrcp.f32 %v635_v52  ;;  %v428_v47 = vadd.f32 %v426_v53, %v1469_v58  ;;  %2281 = vst [vmem:[#allocation21_spill] sm:$0xff] %v1651_v60  ;;  %v1656_v52 = vld [vmem:[%s2225_s4 + $0x4] ss:$0 sm:$0xff] }
  0xb2   :  { %2276 = vst [vmem:[#allocation16_spill] sm:$0xff] %v1600_v7  ;;  %v1609_v54 = vpop.eup %1180  ;;  %v350_v0 = vadd.f32 %v348_v5, %v346_v25  ;;  %v389_v10 = vadd.f32 %v387_v4, %v1504_v16  ;;  %2278 = vst [vmem:[#allocation18_spill] sm:$0xff] %v1629_v46  ;;  %v1644_v25 = vmul.f32 %v1538_v2, %v1419_v37  ;;  %1200 = vrcp.f32 %v636_v13  ;;  %v1696_v7 = vld [vmem:[%s2225_s4 + $0x5] ss:$0 sm:$0xff] }
  0xb3   :  { %v1617_v51 = vpop.eup %1182  ;;  %2282 = vst [vmem:[#allocation22_spill] sm:$0xff] %v1656_v52  ;;  %v469_v56 = vmul.f32 %v1609_v54, %v1421_v38  ;;  %2288 = vst [vmem:[#allocation26_spill] sm:$0xff] %v1696_v7 }
  0xb4   :  { %2277 = vst [vmem:[#allocation17_spill] sm:$0xff] %v1617_v51  ;;  %v1646_v4 = vpop.eup %1184  ;;  %v393_v17 = vadd.f32 %v391_v8, %v389_v10  ;;  %v1678_v51 = vld [vmem:[#allocation2] ss:$0 sm:$0xff]  ;;  %v1682_v8 = vld [vmem:[#allocation2 + $0x2] ss:$0 sm:$0xff] }
  0xb5   :  { %v1619_v11 = vpop.permute.xlu1 %173  ;;  %2280 = vst [vmem:[#allocation20_spill] sm:$0xff] %v1646_v4  ;;  %v1664_v43 = vpop.eup %1186  ;;  %v2283_v4 = vsub.f32 %v1447_v45, %v1377_v21  ;;  %2286 = vst [vmem:[#allocation25_spill] sm:$0xff] %v1682_v8 }
  0xb6   :  { %v180_v53 = vsub.f32 %v170_v3, %v1619_v11  ;;  %v223_v5 = vsub.f32 %v221_v44, %v1619_v11  ;;  %v266_v31 = vsub.f32 %v264_v15, %v1619_v11  ;;  %v309_v23 = vsub.f32 %v307_v61, %v1619_v11  ;;  %v1676_v15 = vpop.eup %1188  ;;  %v1680_v61 = vld [vmem:[#allocation2 + $0x1] ss:$0 sm:$0xff] }
  0xb7   :  { %v352_v22 = vsub.f32 %v350_v0, %v1619_v11  ;;  %1202 = vrcp.f32 %v2283_v4  ;;  %2284 = vst [vmem:[#allocation23_spill] sm:$0xff] %v1676_v15  ;;  %2285 = vst [vmem:[#allocation24_spill] sm:$0xff] %v1680_v61  ;;  %v2287_v0 = vsub.f32 %v1447_v45, %v1385_v27  ;;  %v395_v15 = vsub.f32 %v393_v17, %v1619_v11  ;;  %v1191_v33 = vpop.eup %1190 }
  0xb8   :  { %v186_v13 = vsub.f32 %v180_v53, %v1624_v48  ;;  %v229_v44 = vsub.f32 %v223_v5, %v1629_v46  ;;  %v272_v3 = vsub.f32 %v266_v31, %v1634_v12  ;;  %v315_v10 = vsub.f32 %v309_v23, %v1651_v60  ;;  %v1691_v46 = vld [vmem:[#allocation2 + $0x3] ss:$0 sm:$0xff]  ;;  %v1709_v60 = vld [vmem:[#allocation2 + $0x4] ss:$0 sm:$0xff] }
  0xb9   :  { %1204 = vrcp.f32 %v2287_v0  ;;  %v358_v4 = vsub.f32 %v352_v22, %v1656_v52  ;;  %v430_v5 = vmul.f32 %v1558_v29, %v428_v47  ;;  %v2289_v23 = vsub.f32 %v1488_v6, %v1377_v21  ;;  %2291 = vst [vmem:[#allocation28_spill] sm:$0xff] %v1709_v60 }
  0xba   :  { %v188_v53 = vand.u32 2147483647, %v186_v13  ;;  %v231_v31 = vand.u32 2147483647, %v229_v44  ;;  %v274_v12 = vand.u32 2147483647, %v272_v3  ;;  %v434_v29 = vmul.f32 %v1407_v34, %v1523_v39  ;;  %v1704_v13 = vpop.eup %1192 }
  0xbb   :  { %1206 = vrcp.f32 %v2289_v23  ;;  %v317_v22 = vand.u32 2147483647, %v315_v10  ;;  %v471_v47 = vadd.f32 %v469_v56, %v1469_v58  ;;  %2290 = vst [vmem:[#allocation27_spill] sm:$0xff] %v1704_v13  ;;  %v360_v0 = vand.u32 2147483647, %v358_v4  ;;  %v1195_v52 = vpop.eup %1194 }
  0xbc   :  { %v194_v17 = vmul.f32 %v1678_v51, %v188_v53  ;;  %v237_v44 = vmul.f32 %v1680_v61, %v231_v31  ;;  %v280_v3 = vmul.f32 %v1682_v8, %v274_v12  ;;  %v2292_v10 = vsub.f32 %v1488_v6, %v1385_v27  ;;  %v1720_v31 = vpop.eup %1196 }
  0xbd   :  { %v477_v23 = vmul.f32 %v1412_v35, %v1523_v39  ;;  %v512_v56 = vmul.f32 %v1664_v43, %v1421_v38  ;;  %v520_v53 = vmul.f32 %v1417_v36, %v1523_v39  ;;  %2293 = vst [vmem:[#allocation29_spill] sm:$0xff] %v1720_v31  ;;  %v323_v4 = vmul.f32 %v1691_v46, %v317_v22  ;;  %v1199_v61 = vpop.eup %1198 }
  0xbe   :  { %1208 = vrcp.f32 %v2292_v10  ;;  %v239_v12 = vadd.f32 %v237_v44, %v194_v17  ;;  %v401_v13 = vsub.f32 %v395_v15, %v1696_v7  ;;  %v432_v8 = vadd.f32 %v430_v5, %v1504_v16  ;;  %v1725_v10 = vld [vmem:[#allocation2 + $0x5] ss:$0 sm:$0xff]  ;;  %v1735_v22 = vpop.eup %1200  ;;  %v1741_v7 = vld [vmem:[%s2225_s4 + $0x6] ss:$0 sm:$0xff] }
  0xbf   :  { %2294 = vst [vmem:[#allocation30_spill] sm:$0xff] %v1725_v10  ;;  %v2295_v35 = vsub.f32 %v1502_v14, %v1377_v21  ;;  %v473_v34 = vmul.f32 %v1609_v54, %v471_v47  ;;  %v563_v36 = vmul.f32 %v1428_v40, %v1523_v39  ;;  %v606_v17 = vmul.f32 %v1433_v41, %v1523_v39 }
  0xc0   :  { %2296 = vst [vmem:[#allocation31_spill] sm:$0xff] %v1735_v22  ;;  %v282_v15 = vadd.f32 %v280_v3, %v239_v12  ;;  %v366_v5 = vmul.f32 %v1709_v60, %v360_v0  ;;  %v403_v44 = vand.u32 2147483647, %v401_v13  ;;  %v436_v31 = vadd.f32 %v434_v29, %v432_v8  ;;  %2297 = vst [vmem:[#allocation32_spill] sm:$0xff] %v1741_v7 }
  0xc1   :  { %1210 = vrcp.f32 %v2295_v35  ;;  %v2298_v35 = vsub.f32 %v1515_v24, %v1377_v21  ;;  %v475_v54 = vadd.f32 %v473_v34, %v1504_v16  ;;  %v514_v47 = vadd.f32 %v512_v56, %v1469_v58  ;;  %v1749_v3 = vpop.eup %1202 }
  0xc2   :  { %v555_v22 = vmul.f32 %v1191_v33, %v1421_v38  ;;  %v325_v0 = vadd.f32 %v323_v4, %v282_v15  ;;  %v409_v8 = vmul.f32 %v1725_v10, %v403_v44  ;;  %v438_v29 = vsub.f32 %v436_v31, %v1619_v11  ;;  %v1764_v4 = vld [vmem:[%s2225_s4 + $0x7] ss:$0 sm:$0xff] }
  0xc3   :  { %1212 = vrcp.f32 %v2298_v35  ;;  %v598_v13 = vmul.f32 %v1195_v52, %v1421_v38  ;;  %v1754_v12 = vpop.eup %1204  ;;  %v2300_v35 = vsub.f32 %v1520_v26, %v1377_v21  ;;  %v479_v34 = vadd.f32 %v477_v23, %v475_v54  ;;  %v1771_v23 = vld [vmem:[#allocation2 + $0x6] ss:$0 sm:$0xff] }
  0xc4   :  { %2299 = vst [vmem:[#allocation33_spill] sm:$0xff] %v1754_v12  ;;  %v516_v56 = vmul.f32 %v1664_v43, %v514_v47  ;;  %v557_v41 = vadd.f32 %v555_v22, %v1469_v58  ;;  %v2301_v31 = vsub.f32 %v1571_v62, %v1377_v21  ;;  %v368_v15 = vadd.f32 %v366_v5, %v325_v0 }
  0xc5   :  { %1214 = vrcp.f32 %v2300_v35  ;;  %v444_v44 = vsub.f32 %v438_v29, %v1741_v7  ;;  %v600_v12 = vadd.f32 %v598_v13, %v1469_v58  ;;  %v1207_v35 = vpop.eup %1206  ;;  %2302 = vst [vmem:[#allocation34_spill] sm:$0xff] %v1771_v23  ;;  %v481_v43 = vsub.f32 %v479_v34, %v1619_v11 }
  0xc6   :  { %1216 = vrcp.f32 %v2301_v31  ;;  %v518_v22 = vadd.f32 %v516_v56, %v1504_v16  ;;  %v559_v54 = vmul.f32 %v1191_v33, %v557_v41  ;;  %v641_v47 = vmul.f32 %v1199_v61, %v1421_v38  ;;  %v1784_v56 = vld [vmem:[#allocation2 + $0x7] ss:$0 sm:$0xff]  ;;  %v1789_v33 = vld [vmem:[%s2225_s4 + $0x8] ss:$0 sm:$0xff] }
  0xc7   :  { %v2303_v10 = vsub.f32 %v1584_v9, %v1377_v21  ;;  %v411_v31 = vadd.f32 %v409_v8, %v368_v15  ;;  %v446_v5 = vand.u32 2147483647, %v444_v44  ;;  %v602_v0 = vmul.f32 %v1195_v52, %v600_v12  ;;  %2305 = vst [vmem:[#allocation36_spill] sm:$0xff] %v1784_v56  ;;  %2306 = vst [vmem:[#allocation37_spill] sm:$0xff] %v1789_v33 }
  0xc8   :  { %v1779_v29 = vpop.eup %1208  ;;  %v487_v13 = vsub.f32 %v481_v43, %v1764_v4  ;;  %v522_v7 = vadd.f32 %v520_v53, %v518_v22  ;;  %v561_v60 = vadd.f32 %v559_v54, %v1504_v16  ;;  %v643_v34 = vadd.f32 %v641_v47, %v1469_v58  ;;  %v1802_v22 = vld [vmem:[%s2225_s4 + $0x9] ss:$0 sm:$0xff] }
  0xc9   :  { %1218 = vrcp.f32 %v2303_v10  ;;  %2304 = vst [vmem:[#allocation35_spill] sm:$0xff] %v1779_v29  ;;  %v2307_v41 = vsub.f32 %v1597_v50, %v1377_v21  ;;  %v452_v52 = vmul.f32 %v1771_v23, %v446_v5  ;;  %v604_v10 = vadd.f32 %v602_v0, %v1504_v16  ;;  %2308 = vst [vmem:[#allocation38_spill] sm:$0xff] %v1802_v22 }
  0xca   :  { %v649_v53 = vmul.f32 %v1438_v42, %v1523_v39  ;;  %v489_v12 = vand.u32 2147483647, %v487_v13  ;;  %v524_v15 = vsub.f32 %v522_v7, %v1619_v11  ;;  %v565_v44 = vadd.f32 %v563_v36, %v561_v60  ;;  %v1811_v7 = vld [vmem:[%s2225_s4 + $0xa] ss:$0 sm:$0xff] }
  0xcb   :  { %1220 = vrcp.f32 %v2307_v41  ;;  %v1211_v8 = vpop.eup %1210  ;;  %v645_v43 = vmul.f32 %v1199_v61, %v643_v34  ;;  %v454_v21 = vadd.f32 %v452_v52, %v411_v31  ;;  %v608_v54 = vadd.f32 %v606_v17, %v604_v10  ;;  %2309 = vst [vmem:[#allocation39_spill] sm:$0xff] %v1811_v7  ;;  %v1817_v31 = vld [vmem:[#allocation2 + $0x8] ss:$0 sm:$0xff] }
  0xcc   :  { %v684_v47 = vmul.f32 %v1749_v3, %v1421_v38  ;;  %v692_v5 = vmul.f32 %v1447_v45, %v1523_v39  ;;  %v495_v36 = vmul.f32 %v1784_v56, %v489_v12  ;;  %v530_v60 = vsub.f32 %v524_v15, %v1789_v33  ;;  %2310 = vst [vmem:[#allocation40_spill] sm:$0xff] %v1817_v31 }
  0xcd   :  { %v1213_v0 = vpop.eup %1212  ;;  %v567_v61 = vsub.f32 %v565_v44, %v1619_v11  ;;  %v647_v17 = vadd.f32 %v645_v43, %v1504_v16  ;;  %v610_v13 = vsub.f32 %v608_v54, %v1619_v11  ;;  %v727_v41 = vmul.f32 %v1207_v35, %v1421_v38  ;;  %v1827_v43 = vld [vmem:[#allocation2 + $0x9] ss:$0 sm:$0xff]  ;;  %v1832_v54 = vld [vmem:[%s2225_s4 + $0xb] ss:$0 sm:$0xff] }
  0xce   :  { %v686_v34 = vadd.f32 %v684_v47, %v1469_v58  ;;  %v735_v52 = vmul.f32 %v1488_v6, %v1523_v39  ;;  %v497_v29 = vadd.f32 %v495_v36, %v454_v21  ;;  %v532_v12 = vand.u32 2147483647, %v530_v60  ;;  %v1838_v36 = vld [vmem:[#allocation2 + $0xa] ss:$0 sm:$0xff] }
  0xcf   :  { %v1215_v10 = vpop.eup %1214  ;;  %v573_v15 = vsub.f32 %v567_v61, %v1802_v22  ;;  %v651_v45 = vadd.f32 %v649_v53, %v647_v17  ;;  %v616_v47 = vsub.f32 %v610_v13, %v1811_v7  ;;  %v729_v6 = vadd.f32 %v727_v41, %v1469_v58 }
  0xd0   :  { %v1825_v44 = vpop.eup %1216  ;;  %v688_v56 = vmul.f32 %v1749_v3, %v686_v34  ;;  %v770_v21 = vmul.f32 %v1211_v8, %v1421_v38  ;;  %v538_v53 = vmul.f32 %v1817_v31, %v532_v12  ;;  %v778_v17 = vmul.f32 %v1502_v14, %v1523_v39 }
  0xd1   :  { %v575_v60 = vand.u32 2147483647, %v573_v15  ;;  %v653_v61 = vsub.f32 %v651_v45, %v1619_v11  ;;  %v618_v33 = vand.u32 2147483647, %v616_v47  ;;  %v731_v3 = vmul.f32 %v1207_v35, %v729_v6  ;;  %v1853_v45 = vld [vmem:[#allocation2 + $0xb] ss:$0 sm:$0xff] }
  0xd2   :  { %v690_v13 = vadd.f32 %v688_v56, %v1504_v16  ;;  %v772_v34 = vadd.f32 %v770_v21, %v1469_v58  ;;  %v540_v41 = vadd.f32 %v538_v53, %v497_v29  ;;  %v813_v12 = vmul.f32 %v1213_v0, %v1421_v38  ;;  %2311 = vst [vmem:[#allocation41_spill] sm:$0xff] %v1853_v45  ;;  %v1860_v6 = vld [vmem:[%s2225_s4 + $0xc] ss:$0 sm:$0xff] }
  0xd3   :  { %v1844_v22 = vpop.eup %1218  ;;  %v581_v7 = vmul.f32 %v1827_v43, %v575_v60  ;;  %v659_v23 = vsub.f32 %v653_v61, %v1832_v54  ;;  %v624_v31 = vmul.f32 %v1838_v36, %v618_v33  ;;  %v733_v47 = vadd.f32 %v731_v3, %v1504_v16  ;;  %2312 = vst [vmem:[#allocation42_spill] sm:$0xff] %v1860_v6 }
  0xd4   :  { %v694_v42 = vadd.f32 %v692_v5, %v690_v13  ;;  %v774_v56 = vmul.f32 %v1211_v8, %v772_v34  ;;  %v815_v21 = vadd.f32 %v813_v12, %v1469_v58  ;;  %v821_v53 = vmul.f32 %v1515_v24, %v1523_v39  ;;  %v1871_v8 = vld [vmem:[%s2225_s4 + $0xd] ss:$0 sm:$0xff]  ;;  %v1879_v12 = vld [vmem:[#allocation2 + $0xc] ss:$0 sm:$0xff] }
  0xd5   :  { %v1851_v15 = vpop.eup %1220  ;;  %v583_v35 = vadd.f32 %v581_v7, %v540_v41  ;;  %v661_v29 = vand.u32 2147483647, %v659_v23  ;;  %v737_v61 = vadd.f32 %v735_v52, %v733_v47  ;;  %v856_v5 = vmul.f32 %v1215_v10, %v1421_v38  ;;  %2313 = vst [vmem:[#allocation43_spill] sm:$0xff] %v1871_v8  ;;  %v1884_v47 = vld [vmem:[%s2225_s4 + $0xe] ss:$0 sm:$0xff] }
  0xd6   :  { %v696_v60 = vsub.f32 %v694_v42, %v1619_v11  ;;  %v776_v33 = vadd.f32 %v774_v56, %v1504_v16  ;;  %v817_v7 = vmul.f32 %v1213_v0, %v815_v21  ;;  %v864_v3 = vmul.f32 %v1520_v26, %v1523_v39 }
  0xd7   :  { %v626_v13 = vadd.f32 %v624_v31, %v583_v35  ;;  %v667_v23 = vmul.f32 %v1853_v45, %v661_v29  ;;  %v739_v42 = vsub.f32 %v737_v61, %v1619_v11  ;;  %v858_v41 = vadd.f32 %v856_v5, %v1469_v58  ;;  %v1893_v61 = vld [vmem:[#allocation2 + $0xd] ss:$0 sm:$0xff] }
  0xd8   :  { %v702_v34 = vsub.f32 %v696_v60, %v1860_v6  ;;  %v780_v52 = vadd.f32 %v778_v17, %v776_v33  ;;  %v819_v0 = vadd.f32 %v817_v7, %v1504_v16  ;;  %v899_v56 = vmul.f32 %v1825_v44, %v1421_v38  ;;  %v1903_v7 = vld [vmem:[%s2225_s4 + $0xf] ss:$0 sm:$0xff] }
  0xd9   :  { %v669_v31 = vadd.f32 %v667_v23, %v626_v13  ;;  %v907_v35 = vmul.f32 %v1571_v62, %v1523_v39  ;;  %v745_v17 = vsub.f32 %v739_v42, %v1871_v8  ;;  %v860_v60 = vmul.f32 %v1215_v10, %v858_v41 }
  0xda   :  { %v704_v29 = vand.u32 2147483647, %v702_v34  ;;  %v782_v21 = vsub.f32 %v780_v52, %v1619_v11  ;;  %v823_v33 = vadd.f32 %v821_v53, %v819_v0  ;;  %v901_v5 = vadd.f32 %v899_v56, %v1469_v58  ;;  %v1908_v52 = vld [vmem:[#allocation2 + $0xe] ss:$0 sm:$0xff] }
  0xdb   :  { %v942_v13 = vmul.f32 %v1844_v22, %v1421_v38  ;;  %v950_v23 = vmul.f32 %v1584_v9, %v1523_v39  ;;  %v747_v42 = vand.u32 2147483647, %v745_v17  ;;  %v862_v53 = vadd.f32 %v860_v60, %v1504_v16 }
  0xdc   :  { %v710_v34 = vmul.f32 %v1879_v12, %v704_v29  ;;  %v788_v10 = vsub.f32 %v782_v21, %v1884_v47  ;;  %v825_v41 = vsub.f32 %v823_v33, %v1619_v11  ;;  %v903_v0 = vmul.f32 %v1825_v44, %v901_v5  ;;  %v1919_v21 = vld [vmem:[%s2225_s4 + $0x10] ss:$0 sm:$0xff] }
  0xdd   :  { %v944_v56 = vadd.f32 %v942_v13, %v1469_v58  ;;  %v985_v8 = vmul.f32 %v1851_v15, %v1421_v38  ;;  %v753_v6 = vmul.f32 %v1893_v61, %v747_v42  ;;  %v866_v17 = vadd.f32 %v864_v3, %v862_v53 }
  0xde   :  { %v712_v45 = vadd.f32 %v710_v34, %v669_v31  ;;  %v790_v29 = vand.u32 2147483647, %v788_v10  ;;  %v831_v60 = vsub.f32 %v825_v41, %v1903_v7  ;;  %v905_v33 = vadd.f32 %v903_v0, %v1504_v16  ;;  %v1932_v41 = vld [vmem:[#allocation2 + $0xf] ss:$0 sm:$0xff] }
  0xdf   :  { %v946_v44 = vmul.f32 %v1844_v22, %v944_v56  ;;  %v987_v5 = vadd.f32 %v985_v8, %v1469_v58  ;;  %v2314_v38 = vsub.f32 %v1502_v14, %v1385_v27  ;;  %v868_v13 = vsub.f32 %v866_v17, %v1619_v11  ;;  %v1951_v56 = vld [vmem:[%s2225_s4 + $0x11] ss:$0 sm:$0xff] }
  0xe0   :  { %v755_v31 = vadd.f32 %v753_v6, %v712_v45  ;;  %v796_v3 = vmul.f32 %v1908_v52, %v790_v29  ;;  %v833_v34 = vand.u32 2147483647, %v831_v60  ;;  %v909_v42 = vadd.f32 %v907_v35, %v905_v33  ;;  %2317 = vst [vmem:[#allocation44_spill] sm:$0xff] %v1951_v56 }
  0xe1   :  { %1222 = vrcp.f32 %v2314_v38  ;;  %v948_v10 = vadd.f32 %v946_v44, %v1504_v16  ;;  %v989_v53 = vmul.f32 %v1851_v15, %v987_v5  ;;  %v2315_v58 = vsub.f32 %v1515_v24, %v1385_v27  ;;  %v1962_v38 = vld [vmem:[#allocation2 + $0x10] ss:$0 sm:$0xff] }
  0xe2   :  { %v894_v22 = vsub.f32 %v1571_v62, %v1385_v27  ;;  %v874_v45 = vsub.f32 %v868_v13, %v1919_v21  ;;  %v147_v6 = vadd.f32 %v1476_v63, %v1644_v25  ;;  %v2316_v8 = vsub.f32 %v1520_v26, %v1385_v27 }
  0xe3   :  { %1224 = vrcp.f32 %v2315_v58  ;;  %v937_v15 = vsub.f32 %v1584_v9, %v1385_v27  ;;  %v911_v35 = vsub.f32 %v909_v42, %v1619_v11  ;;  %v952_v0 = vadd.f32 %v950_v23, %v948_v10 }
  0xe4   :  { %1226 = vrcp.f32 %v2316_v8  ;;  %v993_v29 = vmul.f32 %v1597_v50, %v1523_v39  ;;  %v149_v25 = vmul.f32 %v1538_v2, %v147_v6  ;;  %v169_v17 = vmul.f32 %v1365_v18, %v1566_v55  ;;  %v1968_v18 = vpop.permute.xlu0 %177 }
  0xe5   :  { %v212_v60 = vmul.f32 %v1551_v1, %v1419_v37  ;;  %v798_v33 = vadd.f32 %v796_v3, %v755_v31  ;;  %v839_v44 = vmul.f32 %v1932_v41, %v833_v34  ;;  %v876_v23 = vand.u32 2147483647, %v874_v45  ;;  %v1977_v34 = vld [vmem:[%s2225_s4 + $0x12] ss:$0 sm:$0xff] }
  0xe6   :  { %v991_v5 = vadd.f32 %v989_v53, %v1504_v16  ;;  %1228 = vrcp.f32 %v894_v22  ;;  %v159_v13 = vadd.f32 %v1531_v59, %v149_v25  ;;  %v255_v2 = vmul.f32 %v1564_v49, %v1419_v37  ;;  %2318 = vst [vmem:[#allocation45_spill] sm:$0xff] %v1977_v34 }
  0xe7   :  { %v214_v39 = vadd.f32 %v212_v60, %v1476_v63  ;;  %1230 = vrcp.f32 %v937_v15  ;;  %v980_v31 = vsub.f32 %v1597_v50, %v1385_v27  ;;  %v917_v3 = vsub.f32 %v911_v35, %v1951_v56  ;;  %v2001_v60 = vld [vmem:[#allocation2 + $0x11] ss:$0 sm:$0xff] }
  0xe8   :  { %v954_v16 = vsub.f32 %v952_v0, %v1619_v11  ;;  %v171_v42 = vadd.f32 %v169_v17, %v159_v13  ;;  %v220_v53 = vmul.f32 %v1370_v19, %v1566_v55  ;;  %v257_v58 = vadd.f32 %v255_v2, %v1476_v63  ;;  %2319 = vst [vmem:[#allocation46_spill] sm:$0xff] %v2001_v60  ;;  %v2329_v13 = vld [vmem:[#allocation21_spill] sm:$0xff] }
  0xe9   :  { %v216_v10 = vmul.f32 %v1551_v1, %v214_v39  ;;  %v841_v22 = vadd.f32 %v839_v44, %v798_v33  ;;  %v882_v27 = vmul.f32 %v1962_v38, %v876_v23  ;;  %v1984_v45 = vadd.f32 %v993_v29, %v991_v5 }
  0xea   :  { %v298_v6 = vmul.f32 %v1576_v32, %v1419_v37  ;;  %v181_v15 = vsub.f32 %v171_v42, %v1968_v18  ;;  %v259_v1 = vmul.f32 %v1564_v49, %v257_v58  ;;  %v263_v19 = vmul.f32 %v1375_v20, %v1566_v55  ;;  %v2320_v58 = vld [vmem:[#allocation16_spill] sm:$0xff] }
  0xeb   :  { %v1988_v8 = vpop.eup %1222  ;;  %v218_v35 = vadd.f32 %v216_v10, %v1531_v59  ;;  %1232 = vrcp.f32 %v980_v31  ;;  %v919_v0 = vand.u32 2147483647, %v917_v3  ;;  %v1996_v25 = vsub.f32 %v954_v16, %v1977_v34 }
  0xec   :  { %v300_v29 = vadd.f32 %v298_v6, %v1476_v63  ;;  %v187_v33 = vsub.f32 %v181_v15, %v1624_v48  ;;  %v261_v23 = vadd.f32 %v259_v1, %v1531_v59  ;;  %v341_v49 = vmul.f32 %v1589_v57, %v1419_v37 }
  0xed   :  { %v1999_v17 = vpop.eup %1224  ;;  %v222_v44 = vadd.f32 %v220_v53, %v218_v35  ;;  %v2009_v5 = vadd.f32 %v882_v27, %v841_v22  ;;  %v306_v2 = vmul.f32 %v1390_v28, %v1566_v55  ;;  %v2019_v42 = vmul.f32 %v2001_v60, %v919_v0  ;;  %v2321_v28 = vld [vmem:[#allocation18_spill] sm:$0xff]  ;;  %v2322_v35 = vld [vmem:[#allocation8_spill] sm:$0xff]  ;;  %v2330_v60 = vld [vmem:[#allocation25_spill] sm:$0xff] }
  0xee   :  { %v2007_v20 = vpop.eup %1226  ;;  %v302_v39 = vmul.f32 %v1576_v32, %v300_v29  ;;  %v189_v31 = vand.u32 2147483647, %v187_v33  ;;  %v265_v3 = vadd.f32 %v263_v19, %v261_v23  ;;  %v343_v16 = vadd.f32 %v341_v49, %v1476_v63  ;;  %v2323_v33 = vld [vmem:[#allocation17_spill] sm:$0xff]  ;;  %v2324_v49 = vld [vmem:[#allocation19_spill] sm:$0xff] }
  0xef   :  { %v224_v48 = vsub.f32 %v222_v44, %v1968_v18  ;;  %v349_v53 = vmul.f32 %v1395_v30, %v1566_v55  ;;  %v384_v32 = vmul.f32 %v2320_v58, %v1419_v37  ;;  %v392_v1 = vmul.f32 %v2322_v35, %v1566_v55 }
  0xf0   :  { %v304_v10 = vadd.f32 %v302_v39, %v1531_v59  ;;  %v2026_v22 = vpop.eup %1228  ;;  %v267_v6 = vsub.f32 %v265_v3, %v1968_v18  ;;  %v345_v15 = vmul.f32 %v1589_v57, %v343_v16  ;;  %v195_v0 = vmul.f32 %v1678_v51, %v189_v31  ;;  %v2325_v57 = vld [vmem:[#allocation9_spill] sm:$0xff] }
  0xf1   :  { %v230_v27 = vsub.f32 %v224_v48, %v2321_v28  ;;  %v2033_v19 = vpop.eup %1230  ;;  %v386_v30 = vadd.f32 %v384_v32, %v1476_v63  ;;  %v427_v44 = vmul.f32 %v2323_v33, %v1419_v37  ;;  %v435_v3 = vmul.f32 %v2325_v57, %v1566_v55 }
  0xf2   :  { %v308_v29 = vadd.f32 %v306_v2, %v304_v10  ;;  %v273_v39 = vsub.f32 %v267_v6, %v2324_v49  ;;  %v347_v48 = vadd.f32 %v345_v15, %v1531_v59  ;;  %v2326_v2 = vld [vmem:[#allocation20_spill] sm:$0xff]  ;;  %v2328_v6 = vld [vmem:[#allocation10_spill] sm:$0xff] }
  0xf3   :  { %v232_v23 = vand.u32 2147483647, %v230_v27  ;;  %v388_v28 = vmul.f32 %v2320_v58, %v386_v30  ;;  %v429_v51 = vadd.f32 %v427_v44, %v1476_v63  ;;  %v470_v31 = vmul.f32 %v2326_v2, %v1419_v37  ;;  %v2327_v10 = vld [vmem:[#allocation24_spill] sm:$0xff] }
  0xf4   :  { %v310_v16 = vsub.f32 %v308_v29, %v1968_v18  ;;  %v275_v35 = vand.u32 2147483647, %v273_v39  ;;  %v351_v27 = vadd.f32 %v349_v53, %v347_v48  ;;  %v478_v49 = vmul.f32 %v2328_v6, %v1566_v55  ;;  %v2331_v53 = vld [vmem:[#allocation23_spill] sm:$0xff] }
  0xf5   :  { %v238_v32 = vmul.f32 %v2327_v10, %v232_v23  ;;  %v2051_v15 = vpop.eup %1232  ;;  %v390_v29 = vadd.f32 %v388_v28, %v1531_v59  ;;  %v431_v58 = vmul.f32 %v2323_v33, %v429_v51  ;;  %v472_v30 = vadd.f32 %v470_v31, %v1476_v63  ;;  %v2332_v28 = vld [vmem:[#allocation22_spill] sm:$0xff] }
  0xf6   :  { %v316_v57 = vsub.f32 %v310_v16, %v2329_v13  ;;  %v281_v34 = vmul.f32 %v2330_v60, %v275_v35  ;;  %v353_v23 = vsub.f32 %v351_v27, %v1968_v18  ;;  %v513_v39 = vmul.f32 %v2331_v53, %v1419_v37 }
  0xf7   :  { %v240_v44 = vadd.f32 %v238_v32, %v195_v0  ;;  %v394_v10 = vadd.f32 %v392_v1, %v390_v29  ;;  %v433_v6 = vadd.f32 %v431_v58, %v1531_v59  ;;  %v474_v13 = vmul.f32 %v2326_v2, %v472_v30  ;;  %v2333_v0 = vld [vmem:[#allocation11_spill] sm:$0xff]  ;;  %v2335_v58 = vld [vmem:[#allocation26_spill] sm:$0xff] }
  0xf8   :  { %v318_v48 = vand.u32 2147483647, %v316_v57  ;;  %v359_v56 = vsub.f32 %v353_v23, %v2332_v28  ;;  %v515_v33 = vadd.f32 %v513_v39, %v1476_v63  ;;  %v521_v51 = vmul.f32 %v2333_v0, %v1566_v55  ;;  %v2334_v2 = vld [vmem:[#allocation27_spill] sm:$0xff]  ;;  %v2336_v23 = vld [vmem:[#allocation28_spill] sm:$0xff] }
  0xf9   :  { %v283_v16 = vadd.f32 %v281_v34, %v240_v44  ;;  %v396_v31 = vsub.f32 %v394_v10, %v1968_v18  ;;  %v437_v32 = vadd.f32 %v435_v3, %v433_v6  ;;  %v476_v35 = vadd.f32 %v474_v13, %v1531_v59  ;;  %v2338_v6 = vld [vmem:[#allocation32_spill] sm:$0xff] }
  0xfa   :  { %v324_v60 = vmul.f32 %v1691_v46, %v318_v48  ;;  %v361_v1 = vand.u32 2147483647, %v359_v56  ;;  %v517_v27 = vmul.f32 %v2331_v53, %v515_v33  ;;  %v556_v34 = vmul.f32 %v2334_v2, %v1419_v37  ;;  %v2337_v53 = vld [vmem:[#allocation29_spill] sm:$0xff] }
  0xfb   :  { %v564_v57 = vmul.f32 %v1428_v40, %v1566_v55  ;;  %v402_v30 = vsub.f32 %v396_v31, %v2335_v58  ;;  %v439_v44 = vsub.f32 %v437_v32, %v1968_v18  ;;  %v480_v46 = vadd.f32 %v478_v49, %v476_v35  ;;  %v2340_v31 = vld [vmem:[#allocation30_spill] sm:$0xff] }
  0xfc   :  { %v326_v29 = vadd.f32 %v324_v60, %v283_v16  ;;  %v367_v39 = vmul.f32 %v2336_v23, %v361_v1  ;;  %v519_v3 = vadd.f32 %v517_v27, %v1531_v59  ;;  %v558_v56 = vadd.f32 %v556_v34, %v1476_v63  ;;  %v2339_v16 = vld [vmem:[#allocation12_spill] sm:$0xff]  ;;  %v2341_v27 = vld [vmem:[#allocation31_spill] sm:$0xff] }
  0xfd   :  { %v599_v48 = vmul.f32 %v2337_v53, %v1419_v37  ;;  %v404_v10 = vand.u32 2147483647, %v402_v30  ;;  %v445_v13 = vsub.f32 %v439_v44, %v2338_v6  ;;  %v482_v40 = vsub.f32 %v480_v46, %v1968_v18  ;;  %v2343_v46 = vld [vmem:[#allocation34_spill] sm:$0xff]  ;;  %v2345_v6 = vld [vmem:[#allocation33_spill] sm:$0xff] }
  0xfe   :  { %v607_v28 = vmul.f32 %v2339_v16, %v1566_v55  ;;  %v369_v33 = vadd.f32 %v367_v39, %v326_v29  ;;  %v523_v0 = vadd.f32 %v521_v51, %v519_v3  ;;  %v560_v49 = vmul.f32 %v2334_v2, %v558_v56  ;;  %v2342_v51 = vld [vmem:[#allocation13_spill] sm:$0xff]  ;;  %v2346_v16 = vld [vmem:[#allocation36_spill] sm:$0xff] }
  0xff   :  { %v601_v60 = vadd.f32 %v599_v48, %v1476_v63  ;;  %v410_v32 = vmul.f32 %v2340_v31, %v404_v10  ;;  %v447_v35 = vand.u32 2147483647, %v445_v13  ;;  %v488_v1 = vsub.f32 %v482_v40, %v1764_v4  ;;  %v2344_v56 = vld [vmem:[#allocation37_spill] sm:$0xff] }
 0x100   :  { %v642_v34 = vmul.f32 %v2341_v27, %v1419_v37  ;;  %v525_v58 = vsub.f32 %v523_v0, %v1968_v18  ;;  %v562_v30 = vadd.f32 %v560_v49, %v1531_v59  ;;  %v650_v29 = vmul.f32 %v2342_v51, %v1566_v55  ;;  %v2350_v51 = vld [vmem:[#allocation40_spill] sm:$0xff] }
 0x101   :  { %v603_v44 = vmul.f32 %v2337_v53, %v601_v60  ;;  %v412_v2 = vadd.f32 %v410_v32, %v369_v33  ;;  %v453_v23 = vmul.f32 %v2343_v46, %v447_v35  ;;  %v490_v39 = vand.u32 2147483647, %v488_v1  ;;  %v2347_v33 = vld [vmem:[#allocation14_spill] sm:$0xff] }
 0x102   :  { %v644_v3 = vadd.f32 %v642_v34, %v1476_v63  ;;  %v531_v4 = vsub.f32 %v525_v58, %v2344_v56  ;;  %v566_v48 = vadd.f32 %v564_v57, %v562_v30  ;;  %v685_v13 = vmul.f32 %v2345_v6, %v1419_v37  ;;  %v2348_v34 = vld [vmem:[#allocation35_spill] sm:$0xff] }
 0x103   :  { %v605_v10 = vadd.f32 %v603_v44, %v1531_v59  ;;  %v455_v40 = vadd.f32 %v453_v23, %v412_v2  ;;  %v496_v53 = vmul.f32 %v2346_v16, %v490_v39  ;;  %v693_v49 = vmul.f32 %v2347_v33, %v1566_v55  ;;  %v2349_v30 = vld [vmem:[#allocation15_spill] sm:$0xff]  ;;  %v2351_v2 = vld [vmem:[#allocation38_spill] sm:$0xff] }
 0x104   :  { %v646_v0 = vmul.f32 %v2341_v27, %v644_v3  ;;  %v533_v60 = vand.u32 2147483647, %v531_v4  ;;  %v568_v31 = vsub.f32 %v566_v48, %v1968_v18  ;;  %v687_v35 = vadd.f32 %v685_v13, %v1476_v63  ;;  %v2352_v13 = vld [vmem:[#allocation39_spill] sm:$0xff] }
 0x105   :  { %v609_v32 = vadd.f32 %v607_v28, %v605_v10  ;;  %v498_v57 = vadd.f32 %v496_v53, %v455_v40  ;;  %v728_v58 = vmul.f32 %v2348_v34, %v1419_v37  ;;  %v736_v44 = vmul.f32 %v2349_v30, %v1566_v55 }
 0x106   :  { %v648_v1 = vadd.f32 %v646_v0, %v1531_v59  ;;  %v539_v27 = vmul.f32 %v2350_v51, %v533_v60  ;;  %v574_v46 = vsub.f32 %v568_v31, %v2351_v2  ;;  %v689_v39 = vmul.f32 %v2345_v6, %v687_v35 }
 0x107   :  { %v611_v23 = vsub.f32 %v609_v32, %v1968_v18  ;;  %v730_v3 = vadd.f32 %v728_v58, %v1476_v63  ;;  %v771_v56 = vmul.f32 %v1988_v8, %v1419_v37  ;;  %v779_v4 = vmul.f32 %v1502_v14, %v1566_v55 }
 0x108   :  { %v652_v28 = vadd.f32 %v650_v29, %v648_v1  ;;  %v541_v48 = vadd.f32 %v539_v27, %v498_v57  ;;  %v576_v10 = vand.u32 2147483647, %v574_v46  ;;  %v691_v16 = vadd.f32 %v689_v39, %v1531_v59  ;;  %v2354_v39 = vld [vmem:[#allocation41_spill] sm:$0xff] }
 0x109   :  { %v617_v40 = vsub.f32 %v611_v23, %v2352_v13  ;;  %v732_v0 = vmul.f32 %v2348_v34, %v730_v3  ;;  %v773_v29 = vadd.f32 %v771_v56, %v1476_v63  ;;  %v814_v6 = vmul.f32 %v1999_v17, %v1419_v37  ;;  %v2355_v13 = vld [vmem:[#allocation43_spill] sm:$0xff] }
 0x10a   :  { %v654_v53 = vsub.f32 %v652_v28, %v1968_v18  ;;  %v582_v33 = vmul.f32 %v1827_v43, %v576_v10  ;;  %v695_v31 = vadd.f32 %v693_v49, %v691_v16  ;;  %v822_v14 = vmul.f32 %v1515_v24, %v1566_v55 }
 0x10b   :  { %v619_v60 = vand.u32 2147483647, %v617_v40  ;;  %v734_v35 = vadd.f32 %v732_v0, %v1531_v59  ;;  %v775_v57 = vmul.f32 %v1988_v8, %v773_v29  ;;  %v816_v1 = vadd.f32 %v814_v6, %v1476_v63  ;;  %v2353_v8 = vld [vmem:[#allocation42_spill] sm:$0xff] }
 0x10c   :  { %v660_v32 = vsub.f32 %v654_v53, %v1832_v54  ;;  %v584_v34 = vadd.f32 %v582_v33, %v541_v48  ;;  %v697_v30 = vsub.f32 %v695_v31, %v1968_v18  ;;  %v857_v43 = vmul.f32 %v2007_v20, %v1419_v37 }
 0x10d   :  { %v625_v58 = vmul.f32 %v1838_v36, %v619_v60  ;;  %v738_v51 = vadd.f32 %v736_v44, %v734_v35  ;;  %v777_v24 = vadd.f32 %v775_v57, %v1531_v59  ;;  %v818_v54 = vmul.f32 %v1999_v17, %v816_v1  ;;  %v1118_v35 = vld [vmem:[%s2225_s4 + $0x13] ss:$0 sm:$0xff] }
 0x10e   :  { %v662_v49 = vand.u32 2147483647, %v660_v32  ;;  %v962_v27 = vand.u32 2147483647, %v1996_v25  ;;  %v703_v46 = vsub.f32 %v697_v30, %v2353_v8  ;;  %v859_v23 = vadd.f32 %v857_v43, %v1476_v63  ;;  %v91_v43 = vpop.permute.xlu1 %90 }
 0x10f   :  { %v627_v2 = vadd.f32 %v625_v58, %v584_v34  ;;  %v740_v28 = vsub.f32 %v738_v51, %v1968_v18  ;;  %v781_v3 = vadd.f32 %v779_v4, %v777_v24  ;;  %v820_v56 = vadd.f32 %v818_v54, %v1531_v59 }
 0x110   :  { %v668_v36 = vmul.f32 %v2354_v39, %v662_v49  ;;  %v705_v48 = vand.u32 2147483647, %v703_v46  ;;  %v861_v44 = vmul.f32 %v2007_v20, %v859_v23  ;;  %v865_v17 = vmul.f32 %v1520_v26, %v1566_v55 }
 0x111   :  { %v900_v25 = vmul.f32 %v2026_v22, %v1419_v37  ;;  %v746_v40 = vsub.f32 %v740_v28, %v2355_v13  ;;  %v783_v16 = vsub.f32 %v781_v3, %v1968_v18  ;;  %v824_v53 = vadd.f32 %v822_v14, %v820_v56 }
 0x112   :  { %v670_v10 = vadd.f32 %v668_v36, %v627_v2  ;;  %v711_v0 = vmul.f32 %v1879_v12, %v705_v48  ;;  %v863_v4 = vadd.f32 %v861_v44, %v1531_v59  ;;  %v943_v20 = vmul.f32 %v2033_v19, %v1419_v37  ;;  %v95_v44 = vpop.permute.xlu1 %94 }
 0x113   :  { %v902_v29 = vadd.f32 %v900_v25, %v1476_v63  ;;  %v748_v6 = vand.u32 2147483647, %v746_v40  ;;  %v789_v26 = vsub.f32 %v783_v16, %v1884_v47  ;;  %v826_v33 = vsub.f32 %v824_v53, %v1968_v18  ;;  %v2359_v16 = vld [vmem:[#allocation46_spill] sm:$0xff] }
 0x114   :  { %v908_v60 = vmul.f32 %v1571_v62, %v1566_v55  ;;  %v713_v31 = vadd.f32 %v711_v0, %v670_v10  ;;  %v867_v32 = vadd.f32 %v865_v17, %v863_v4  ;;  %v945_v12 = vadd.f32 %v943_v20, %v1476_v63  ;;  %v2358_v10 = vld [vmem:[#allocation45_spill] sm:$0xff] }
 0x115   :  { %v904_v14 = vmul.f32 %v2026_v22, %v902_v29  ;;  %v754_v57 = vmul.f32 %v1893_v61, %v748_v6  ;;  %v791_v1 = vand.u32 2147483647, %v789_v26  ;;  %v832_v47 = vsub.f32 %v826_v33, %v1903_v7  ;;  %v1116_v7 = vld [vmem:[#allocation2 + $0x12] ss:$0 sm:$0xff] }
 0x116   :  { %v986_v34 = vmul.f32 %v2051_v15, %v1419_v37  ;;  %v869_v62 = vsub.f32 %v867_v32, %v1968_v18  ;;  %v947_v22 = vmul.f32 %v2033_v19, %v945_v12  ;;  %v951_v30 = vmul.f32 %v1584_v9, %v1566_v55  ;;  %v77_v33 = vpop.permute.xlu1 %76 }
 0x117   :  { %v906_v58 = vadd.f32 %v904_v14, %v1531_v59  ;;  %v756_v49 = vadd.f32 %v754_v57, %v713_v31  ;;  %v797_v51 = vmul.f32 %v1908_v52, %v791_v1  ;;  %v834_v61 = vand.u32 2147483647, %v832_v47 }
 0x118   :  { %v988_v24 = vadd.f32 %v986_v34, %v1476_v63  ;;  %v2356_v37 = vsub.f32 %v1984_v45, %v1619_v11  ;;  %v875_v2 = vsub.f32 %v869_v62, %v1919_v21  ;;  %v949_v19 = vadd.f32 %v947_v22, %v1531_v59 }
 0x119   :  { %v910_v8 = vadd.f32 %v908_v60, %v906_v58  ;;  %v799_v46 = vadd.f32 %v797_v51, %v756_v49  ;;  %v840_v9 = vmul.f32 %v1932_v41, %v834_v61  ;;  %v994_v52 = vmul.f32 %v1597_v50, %v1566_v55  ;;  %v2357_v41 = vld [vmem:[#allocation44_spill] sm:$0xff]  ;;  %v1119_v55 = vld [vmem:[#allocation2 + $0x13] ss:$0 sm:$0xff] }
 0x11a   :  { %v1003_v54 = vsub.f32 %v2356_v37, %v1118_v35  ;;  %v990_v23 = vmul.f32 %v2051_v15, %v988_v24  ;;  %v877_v39 = vand.u32 2147483647, %v875_v2  ;;  %v953_v36 = vadd.f32 %v951_v30, %v949_v19 }
 0x11b   :  { %v912_v63 = vsub.f32 %v910_v8, %v1968_v18  ;;  %v927_v11 = vadd.f32 %v2019_v42, %v2009_v5  ;;  %v968_v45 = vmul.f32 %v1116_v7, %v962_v27  ;;  %v842_v21 = vadd.f32 %v840_v9, %v799_v46  ;;  %v1059_v5 = vld [vmem:[%s2224_s3] ss:$0 sm:$0xff] }
 0x11c   :  { %v992_v28 = vadd.f32 %v990_v23, %v1531_v59  ;;  %v1005_v3 = vand.u32 2147483647, %v1003_v54  ;;  %v883_v56 = vmul.f32 %v1962_v38, %v877_v39  ;;  %v955_v15 = vsub.f32 %v953_v36, %v1968_v18  ;;  %v1058_v59 = vld [vmem:[%s2223_s2] ss:$0 sm:$0xff]  ;;  %v72_v38 = vpop.permute.xlu0 %71  ;;  %s1294_s2 = smov [#allocation5]  }
 0x11d   :  { %v918_v48 = vsub.f32 %v912_v63, %v2357_v41  ;;  %v970_v27 = vadd.f32 %v968_v45, %v927_v11  ;;  %v103_v29 = vsub.f32 %v91_v43, %v1059_v5  ;;  %v85_v20 = vsub.f32 %v72_v38, %v1058_v59  ;;  %s1046_s3 = sshll.u32 %s1294_s2, 4  ;;  %s1047_s3 = int_to_ptr.vmem [resolvable:$true] %s1046_s3 }
 0x11e   :  { %v996_v50 = vadd.f32 %v994_v52, %v992_v28  ;;  %v885_v17 = vadd.f32 %v883_v56, %v842_v21  ;;  %v961_v13 = vsub.f32 %v955_v15, %v2358_v10  ;;  %v1011_v40 = vmul.f32 %v1119_v55, %v1005_v3  ;;  %s1256_s30 = scalar_lea.vmem %s1047_s3, 256  ;;  %p1261_p9 = scmp.lt.s32.totalorder %s1047_s3, %s1047_s3 }
 0x11f   :  { %v920_v25 = vand.u32 2147483647, %v918_v48  ;;  %v105_v12 = vand.u32 2147483647, %v103_v29  ;;  %v104_v57 = vsub.f32 %v95_v44, %v1059_v5  ;;  %v87_v1 = vand.u32 2147483647, %v85_v20  ;;  %p1257_p8 = scmp.ne.s32.totalorder %s1047_s3, %s1256_s30  ;;  %p1262_p10 = scmp.lt.s32.totalorder %s1256_s30, %s1256_s30 }
 0x120   :  { %v998_v42 = vsub.f32 %v996_v50, %v1968_v18  ;;  %v963_v0 = vand.u32 2147483647, %v961_v13  ;;  %v1013_v31 = vadd.f32 %v1011_v40, %v970_v27  ;;  %v86_v47 = vsub.f32 %v77_v33, %v1058_v59 }
 0x121   :  { %v926_v53 = vmul.f32 %v2359_v16, %v920_v25  ;;  %v1031_v58 = vmul.f32 2.0, %v105_v12  ;;  %v106_v22 = vand.u32 2147483647, %v104_v57  ;;  %v1035_v30 = vmul.f32 2.0, %v87_v1  ;;  %p1263_p11 = por %p1262_p10, %p1261_p9 }
 0x122   :  { %v1004_v4 = vsub.f32 %v998_v42, %v1118_v35  ;;  %v969_v26 = vmul.f32 %v1116_v7, %v963_v0  ;;  %v1017_v18 = vmul.f32 5.0, %v1013_v31  ;;  %v88_v43 = vand.u32 2147483647, %v86_v47 }
 0x123   :  { %v928_v6 = vadd.f32 %v926_v53, %v885_v17  ;;  %v1032_v24 = vmul.f32 2.0, %v106_v22  ;;  %p1264_p12 = pnand %p1263_p11, %p1257_p8 }
 0x124   :  { %v1006_v60 = vand.u32 2147483647, %v1004_v4  ;;  %v1036_v54 = vmul.f32 2.0, %v88_v43 }
 0x125   :  { %v971_v32 = vadd.f32 %v969_v26, %v928_v6 }
 0x126   :  { %v1012_v14 = vmul.f32 %v1119_v55, %v1006_v60 }
 0x127   :  { %v1022_v62 = vpop.permute.xlu1 %1021 }
 0x128   :  { %v1014_v34 = vadd.f32 %v1012_v14, %v971_v32  ;;  %v1029_v35 = vadd.f32 %v1022_v62, %v1017_v18 }
 0x12a   :  { %v1033_v49 = vadd.f32 %v1031_v58, %v1029_v35  ;;  %v1018_v51 = vmul.f32 5.0, %v1014_v34 }
 0x12b   :  { %v1027_v61 = vpop.permute.xlu0 %1026 }
 0x12c   :  { %v1037_v7 = vadd.f32 %v1035_v30, %v1033_v49  ;;  %v1030_v37 = vadd.f32 %v1027_v61, %v1018_v51 }
 0x12e   :  { %1039 = vst [vmem:[#allocation5] sm:$0xff] %v1037_v7  ;;  %v1034_v2 = vadd.f32 %v1032_v24, %v1030_v37 }
 0x130   :  { %v1038_v8 = vadd.f32 %v1036_v54, %v1034_v2 }
 0x132   :  { %1040 = vst [vmem:[#allocation5 + $0x8] sm:$0xff] %v1038_v8 }
 0x133   :  { %1267 = shalt.err (!%p1264_p12)
}
 0x134   :  { %s1268_s10 = scalar_lea.hbm %s2228_s7, 256 }
 0x135   :  { %p1269_p13 = scmp.ne.s32.totalorder %s2228_s7, %s1268_s10  ;;  %p1272_p0 = scmp.lt.u32.totalorder %s1268_s10, %s2228_s7 }
 0x137   :  { %p1274_p1 = pnand %p1272_p0, %p1269_p13 }
 0x139   :  { %1277 = shalt.err (!%p1274_p1)
}
 0x13a   :  { %1052 = dma.vmem_to_hbm [thread:$0]  %s1047_s3, 256, %s2228_s7, [#allocation4], %s1283_s11, %s1283_s11, %s1284_s12  }
 0x13b   :  { %1280 = dma.done.wait [#allocation4], 256  }
 0x13c   :  { %1281 = vsyncadd [#allocation4], 4294967040 }
 0x13d   :  { %1056 = vsyncpa [#allocation3], 1 }
 0x13e   :  { %1057 = vsyncpa [#allocation4], 1 }

</bundles_post_ra>
